<compile_context>
chip_gen: v7x
topology: tpu7x:2x2x1
jax: 0.10.0
libtpu: 0.0.40
codegen_flags: <defaults>
</compile_context>

<pallas_src>
import functools

import jax
import jax.numpy as jnp
from jax import lax
from jax.experimental import pallas as pl
from jax.experimental.pallas import tpu as pltpu

NUM_GROUPS = 32
EPS = 1e-5
LANE = 128


def _vmem_capacity_bytes():
    """Per-TensorCore VMEM capacity; conservative fallback = v7x (64 MiB)."""
    try:
        cap = getattr(pltpu.get_tpu_info(), "vmem_capacity_bytes", None)
        if cap:
            return int(cap)
    except Exception:
        pass
    return 64 * 1024 * 1024


def _choose_oh_tile(OH, OW, C_pad, vmem_cap):
    """Largest divisor of OH whose f32 accumulator tile fits a generation-aware
    budget and keeps the (S_tile, C_pad) in-VMEM stores (8,128)-aligned."""
    budget = max(512 * 1024, vmem_cap // 64)
    best = OH
    for cand in range(OH, 0, -1):
        if OH % cand:
            continue
        s_tile = cand * OW
        if s_tile % 8:
            continue
        if s_tile * C_pad * 4 <= budget:
            return cand
        best = cand
    return best


def _stdconv_kernel(x_ref, w_ref, b_ref, g_ref, beta_ref, m_ref, o_ref,
                    s1_ref, s2_ref, *, KH, KW, stride, dilation, TOH, OW,
                    num_tiles, inv_count, apply_norm, apply_relu):
    """One (sample n, row-tile t) grid step.

    x_ref   : (1, IH_need, W_eff, C_in) bf16  padded NHWC sample (resident per n)
    w_ref   : (KH*KW*C_in, C_pad)       bf16  K-folded conv weights (chan padded)
    b/g/beta: (1, C_pad)                f32   bias / GN gamma / GN beta
    m_ref   : (C_pad, C_pad)            f32   group-membership matrix
    o_ref   : (1, S, C_pad)             f32   full-sample output, VMEM resident
                                              across t (accumulator pattern)
    s1/s2   : (1, C_pad)                f32   per-channel sum / sum-of-squares
    """
    t = pl.program_id(1)
    S_tile = TOH * OW
    C_in = x_ref.shape[-1]
    K_dim = KH * KW * C_in
    IH_blk = (TOH - 1) * stride + (KH - 1) * dilation + 1

    # ---- load this tile's row window (only a (KH-1)*dilation halo redundant
    #      vs the neighbouring tile) and build the im2col patch once ----
    row0 = pl.multiple_of(t * (TOH * stride), TOH * stride)
    x_win = x_ref[0, pl.ds(row0, IH_blk), :, :]          # (IH_blk, W_eff, C_in)

    taps = []
    for kh in range(KH):
        for kw in range(KW):
            r0 = kh * dilation
            c0 = kw * dilation
            if stride == 1:
                tap = x_win[r0:r0 + TOH, c0:c0 + OW, :]
            else:
                # TODO(synk): stride-2 reduction cells: pre-splitting even/odd
                # phases in the wrapper would avoid strided value slices.
                tap = x_win[r0:r0 + (TOH - 1) * stride + 1:stride,
                            c0:c0 + (OW - 1) * stride + 1:stride, :]
            taps.append(tap)
    patch = jnp.concatenate(taps, axis=-1).reshape(S_tile, K_dim)   # bf16

    # ---- single K-folded MXU matmul (replaces KH*KW K=C_in matmuls + RMW) ----
    acc = jnp.dot(patch, w_ref[...], preferred_element_type=jnp.float32)
    acc = acc + b_ref[...]                               # (S_tile, C_pad) f32

    off = pl.multiple_of(t * S_tile, S_tile)

    if not apply_norm:
        y = jnp.maximum(acc, 0.0) if apply_relu else acc
        o_ref[0, pl.ds(off, S_tile), :] = y.astype(o_ref.dtype)
        return

    @pl.when(t == 0)
    def _init_stats():
        s1_ref[...] = jnp.zeros_like(s1_ref)
        s2_ref[...] = jnp.zeros_like(s2_ref)

    # GroupNorm statistics via sublane (XLU) reductions — keeps the MXU free.
    s1_ref[...] += jnp.sum(acc, axis=0, keepdims=True)
    s2_ref[...] += jnp.sum(acc * acc, axis=0, keepdims=True)

    # Stash the un-normalized conv output in the resident output block — the
    # normalization sweep below never recomputes the conv.
    o_ref[0, pl.ds(off, S_tile), :] = acc

    @pl.when(t == num_tiles - 1)
    def _finalize():
        # Per-sample normalization constants, computed exactly once per sample.
        gsum = jnp.dot(s1_ref[...], m_ref[...],
                       preferred_element_type=jnp.float32)       # (1, C_pad)
        gsq = jnp.dot(s2_ref[...], m_ref[...],
                      preferred_element_type=jnp.float32)
        gmean = gsum * inv_count
        gvar = gsq * inv_count - gmean * gmean           # biased var (PyTorch GN)
        inv_std = lax.rsqrt(gvar + EPS)
        scale = g_ref[...] * inv_std                     # (1, C_pad)
        shift = beta_ref[...] - gmean * scale
        # Normalize the whole (VMEM-resident) sample in place: FMA + ReLU.
        for tt in range(num_tiles):
            o0 = tt * S_tile
            y = o_ref[0, o0:o0 + S_tile, :] * scale + shift
            if apply_relu:
                y = jnp.maximum(y, 0.0)
            o_ref[0, o0:o0 + S_tile, :] = y.astype(o_ref.dtype)


def std_conv(x_nchw, weight, bias, gamma=None, beta=None, *, stride, padding,
             dilation=1, norm=True, relu=True, oh_tile=None):
    """Fused Conv2d -> GroupNorm(32) -> ReLU (PyTorch StdConv) forward.

    x_nchw: (N, C_in, H, W) f32; weight: (C_out, C_in, KH, KW);
    bias/gamma/beta: (C_out,). Returns (N, C_out, OH, OW) f32.
    """
    N, C_in, H, W = x_nchw.shape
    C_out, Cw_in, KH, KW = weight.shape
    assert Cw_in == C_in
    if norm:
        assert C_out % NUM_GROUPS == 0, "GroupNorm(32) needs C_out % 32 == 0"

    OH = (H + 2 * padding - dilation * (KH - 1) - 1) // stride + 1
    OW = (W + 2 * padding - dilation * (KW - 1) - 1) // stride + 1
    S = OH * OW
    C_pad = ((C_out + LANE - 1) // LANE) * LANE          # lane-dense output
    K_dim = KH * KW * C_in

    vmem_cap = _vmem_capacity_bytes()
    if oh_tile is None:
        oh_tile = _choose_oh_tile(OH, OW, C_pad, vmem_cap)
    assert OH % oh_tile == 0
    T = OH // oh_tile
    S_tile = oh_tile * OW

    IH_need = (OH - 1) * stride + (KH - 1) * dilation + 1
    W_eff = (OW - 1) * stride + (KW - 1) * dilation + 1

    # ---- glue: NCHW->NHWC, bf16, spatial zero-pad, trim to what the conv
    #      reads.  No im2col / no overlapping row-tile stack in HBM. ----
    x = jnp.transpose(x_nchw, (0, 2, 3, 1)).astype(jnp.bfloat16)
    xp = jnp.pad(x, ((0, 0), (padding, padding), (padding, padding), (0, 0)))
    xp = xp[:, :IH_need, :W_eff, :]                      # (N, IH_need, W_eff, C_in)

    # Weights -> (KH*KW*C_in, C_pad) bf16 for one K-folded matmul per tile.
    w = jnp.transpose(weight, (2, 3, 1, 0)).reshape(K_dim, C_out)
    w = jnp.pad(w, ((0, 0), (0, C_pad - C_out))).astype(jnp.bfloat16)

    def _vec(v):
        return jnp.pad(v.astype(jnp.float32).reshape(-1),
                       (0, C_pad - C_out)).reshape(1, C_pad)

    b2 = _vec(bias)
    if norm:
        g2, bt2 = _vec(gamma), _vec(beta)
        gsize = C_out // NUM_GROUPS
        ch = jnp.arange(C_pad)
        gid = ch // gsize
        valid = ch < C_out
        # Group-membership matrix; padded channels belong to no group so they
        # never dilute the real statistics (and their gamma/beta are zero).
        M = ((gid[:, None] == gid[None, :])
             & valid[:, None] & valid[None, :]).astype(jnp.float32)
        inv_count = 1.0 / float(S * gsize)
    else:
        g2 = bt2 = jnp.zeros((1, C_pad), jnp.float32)
        M = jnp.zeros((C_pad, C_pad), jnp.float32)
        inv_count = 1.0

    kern = functools.partial(
        _stdconv_kernel, KH=KH, KW=KW, stride=stride, dilation=dilation,
        TOH=oh_tile, OW=OW, num_tiles=T, inv_count=inv_count,
        apply_norm=norm, apply_relu=relu)

    # Generation-aware VMEM budget (v7x: 64 MiB; v5e/v6e: 128 MiB).
    need = (2 * IH_need * W_eff * C_in * 2               # resident input block
            + 2 * K_dim * C_pad * 2                      # weights
            + 2 * C_pad * C_pad * 4                      # membership matrix
            + 6 * C_pad * 4                              # bias / gamma / beta
            + 2 * S * C_pad * 4                          # resident output block
            + 2 * C_pad * 4                              # stats scratch
            + 2 * S_tile * (K_dim * 2 + C_pad * 4))      # in-flight temporaries
    vmem_limit = max(min(vmem_cap // 2, max(32 * 1024 * 1024, 2 * need)),
                     need + 4 * 1024 * 1024)

    out = pl.pallas_call(
        kern,
        out_shape=jax.ShapeDtypeStruct((N, S, C_pad), jnp.float32),
        grid=(N, T),
        in_specs=[
            pl.BlockSpec((1, IH_need, W_eff, C_in), lambda n, t: (n, 0, 0, 0)),
            pl.BlockSpec((K_dim, C_pad), lambda n, t: (0, 0)),
            pl.BlockSpec((1, C_pad), lambda n, t: (0, 0)),
            pl.BlockSpec((1, C_pad), lambda n, t: (0, 0)),
            pl.BlockSpec((1, C_pad), lambda n, t: (0, 0)),
            pl.BlockSpec((C_pad, C_pad), lambda n, t: (0, 0)),
        ],
        # Full-sample output block, resident across t (accumulator pattern).
        out_specs=pl.BlockSpec((1, S, C_pad), lambda n, t: (n, 0, 0)),
        scratch_shapes=[pltpu.VMEM((1, C_pad), jnp.float32),
                        pltpu.VMEM((1, C_pad), jnp.float32)],
        compiler_params=pltpu.CompilerParams(
            dimension_semantics=("parallel", "arbitrary"),
            vmem_limit_bytes=int(vmem_limit)),
    )(xp, w, b2, g2, bt2, M)

    out = out[:, :, :C_out].reshape(N, OH, OW, C_out)
    return jnp.transpose(out, (0, 3, 1, 2))


def _reference(x, weight, bias, gamma, beta, stride, padding, dilation):
    # Matches the kernel's numerics: bf16-quantized conv operands, f32 accum.
    xq = x.astype(jnp.bfloat16).astype(jnp.float32)
    wq = weight.astype(jnp.bfloat16).astype(jnp.float32)
    y = lax.conv_general_dilated(
        xq, wq, window_strides=(stride, stride),
        padding=[(padding, padding), (padding, padding)],
        rhs_dilation=(dilation, dilation),
        dimension_numbers=("NCHW", "OIHW", "NCHW"),
        precision=lax.Precision.HIGHEST)
    y = y + bias.reshape(1, -1, 1, 1)
    N, C, Hh, Ww = y.shape
    yg = y.reshape(N, NUM_GROUPS, C // NUM_GROUPS, Hh, Ww)
    mean = jnp.mean(yg, axis=(2, 3, 4), keepdims=True)
    var = jnp.mean((yg - mean) ** 2, axis=(2, 3, 4), keepdims=True)
    yn = ((yg - mean) / jnp.sqrt(var + EPS)).reshape(N, C, Hh, Ww)
    yn = yn * gamma.reshape(1, -1, 1, 1) + beta.reshape(1, -1, 1, 1)
    return jnp.maximum(yn, 0.0)


if __name__ == "__main__":
    # StdConv(C_in=4, C_out=64, kernel_size=3, stride=1, padding=1) from MixedOp.
    N, C_in, H, W = 2, 4, 16, 16
    C_out, KH, KW = 64, 3, 3          # C_out divisible by 32 (GroupNorm)
    stride, padding, dilation = 1, 1, 1

    key = jax.random.PRNGKey(0)
    kx, kw_, kb, kg, kbt = jax.random.split(key, 5)
    x = jax.random.normal(kx, (N, C_in, H, W), dtype=jnp.float32)
    fan_in = C_in * KH * KW
    weight = jax.random.uniform(kw_, (C_out, C_in, KH, KW), jnp.float32,
                                minval=-1.0, maxval=1.0) / jnp.sqrt(fan_in)
    bias = jax.random.uniform(kb, (C_out,), jnp.float32, -0.1, 0.1)
    gamma = 1.0 + 0.1 * jax.random.normal(kg, (C_out,), jnp.float32)
    beta = 0.1 * jax.random.normal(kbt, (C_out,), jnp.float32)

    # oh_tile=8 -> 2 row tiles per sample: exercises the cross-tile GroupNorm
    # statistics accumulation and the in-place final normalization sweep.
    out = std_conv(x, weight, bias, gamma, beta, stride=stride, padding=padding,
                   dilation=dilation, norm=True, relu=True, oh_tile=8)
    out = jax.block_until_ready(out)

    ref = _reference(x, weight, bias, gamma, beta, stride, padding, dilation)
    assert out.shape == ref.shape, (out.shape, ref.shape)
    err = float(jnp.max(jnp.abs(out - ref)))
    assert jnp.allclose(out, ref, atol=2e-3, rtol=2e-3), err

    print("KERNEL_OK")
</pallas_src>

<mosaic_0001>
module attributes {stable_mosaic.version = 11 : i64} {
  func.func @_stdconv_kernel(%arg0: i32, %arg1: i32, %arg2: memref<1x18x18x4xbf16, #tpu.memory_space<vmem>>, %arg3: memref<36x128xbf16, #tpu.memory_space<vmem>>, %arg4: memref<1x128xf32, #tpu.memory_space<vmem>>, %arg5: memref<1x128xf32, #tpu.memory_space<vmem>>, %arg6: memref<1x128xf32, #tpu.memory_space<vmem>>, %arg7: memref<128x128xf32, #tpu.memory_space<vmem>>, %arg8: memref<1x256x128xf32, #tpu.memory_space<vmem>>, %arg9: memref<1x128xf32, #tpu.memory_space<vmem>>, %arg10: memref<1x128xf32, #tpu.memory_space<vmem>>) attributes {dimension_semantics = [#tpu.dimension_semantics<parallel>, #tpu.dimension_semantics<arbitrary>], iteration_bounds = array<i64: 2, 2>, scalar_prefetch = 0 : i64, scratch_operands = 2 : i64, tpu.core_type = #tpu.core_type<tc>, window_params = [{transform_indices = @transform_0, window_bounds = array<i64: 1, 18, 18, 4>}, {pipeline_mode = #tpu.pipeline_mode<synchronous>, transform_indices = @transform_1, window_bounds = array<i64: 36, 128>}, {pipeline_mode = #tpu.pipeline_mode<synchronous>, transform_indices = @transform_2, window_bounds = array<i64: 1, 128>}, {pipeline_mode = #tpu.pipeline_mode<synchronous>, transform_indices = @transform_3, window_bounds = array<i64: 1, 128>}, {pipeline_mode = #tpu.pipeline_mode<synchronous>, transform_indices = @transform_4, window_bounds = array<i64: 1, 128>}, {pipeline_mode = #tpu.pipeline_mode<synchronous>, transform_indices = @transform_5, window_bounds = array<i64: 128, 128>}, {transform_indices = @transform_6, window_bounds = array<i64: 1, 256, 128>}]} {
    %c8_i32 = arith.constant 8 : i32
    %0 = arith.muli %arg1, %c8_i32 : i32
    %1 = tpu.assume_multiple %0, 8 : i32
    %c0 = arith.constant 0 : index
    %2 = arith.index_cast %1 : i32 to index
    %c0_0 = arith.constant 0 : index
    %c0_1 = arith.constant 0 : index
    %3 = vector.load %arg2[%c0, %2, %c0_0, %c0_1] : memref<1x18x18x4xbf16, #tpu.memory_space<vmem>>, vector<1x10x18x4xbf16>
    %4 = vector.shape_cast %3 : vector<1x10x18x4xbf16> to vector<10x18x4xbf16>
    %5 = vector.extract_strided_slice %4 {offsets = [0, 0, 0], sizes = [8, 16, 4], strides = [1, 1, 1]} : vector<10x18x4xbf16> to vector<8x16x4xbf16>
    %6 = vector.extract_strided_slice %4 {offsets = [0, 1, 0], sizes = [8, 16, 4], strides = [1, 1, 1]} : vector<10x18x4xbf16> to vector<8x16x4xbf16>
    %7 = vector.extract_strided_slice %4 {offsets = [0, 2, 0], sizes = [8, 16, 4], strides = [1, 1, 1]} : vector<10x18x4xbf16> to vector<8x16x4xbf16>
    %8 = vector.extract_strided_slice %4 {offsets = [1, 0, 0], sizes = [8, 16, 4], strides = [1, 1, 1]} : vector<10x18x4xbf16> to vector<8x16x4xbf16>
    %9 = vector.extract_strided_slice %4 {offsets = [1, 1, 0], sizes = [8, 16, 4], strides = [1, 1, 1]} : vector<10x18x4xbf16> to vector<8x16x4xbf16>
    %10 = vector.extract_strided_slice %4 {offsets = [1, 2, 0], sizes = [8, 16, 4], strides = [1, 1, 1]} : vector<10x18x4xbf16> to vector<8x16x4xbf16>
    %11 = vector.extract_strided_slice %4 {offsets = [2, 0, 0], sizes = [8, 16, 4], strides = [1, 1, 1]} : vector<10x18x4xbf16> to vector<8x16x4xbf16>
    %12 = vector.extract_strided_slice %4 {offsets = [2, 1, 0], sizes = [8, 16, 4], strides = [1, 1, 1]} : vector<10x18x4xbf16> to vector<8x16x4xbf16>
    %13 = vector.extract_strided_slice %4 {offsets = [2, 2, 0], sizes = [8, 16, 4], strides = [1, 1, 1]} : vector<10x18x4xbf16> to vector<8x16x4xbf16>
    %14 = tpu.concatenate %5, %6, %7, %8, %9, %10, %11, %12, %13 in 2 : vector<8x16x4xbf16>, vector<8x16x4xbf16>, vector<8x16x4xbf16>, vector<8x16x4xbf16>, vector<8x16x4xbf16>, vector<8x16x4xbf16>, vector<8x16x4xbf16>, vector<8x16x4xbf16>, vector<8x16x4xbf16> -> vector<8x16x36xbf16>
    %15 = vector.shape_cast %14 : vector<8x16x36xbf16> to vector<128x36xbf16>
    %c0_2 = arith.constant 0 : index
    %c0_3 = arith.constant 0 : index
    %16 = vector.load %arg3[%c0_2, %c0_3] : memref<36x128xbf16, #tpu.memory_space<vmem>>, vector<36x128xbf16>
    %cst = arith.constant dense<0.000000e+00> : vector<128x128xf32>
    %17 = tpu.matmul %15, %16, %cst {dimension_numbers = #tpu.dot_dimension_numbers<[1], [0], [0], [1], [0, 0, 1, 1], [], []>} : vector<128x36xbf16>, vector<36x128xbf16>, vector<128x128xf32> -> vector<128x128xf32>
    %c0_4 = arith.constant 0 : index
    %c0_5 = arith.constant 0 : index
    %18 = vector.load %arg4[%c0_4, %c0_5] : memref<1x128xf32, #tpu.memory_space<vmem>>, vector<1x128xf32>
    %19 = vector.broadcast %18 : vector<1x128xf32> to vector<128x128xf32>
    %20 = arith.addf %17, %19 : vector<128x128xf32>
    %c128_i32 = arith.constant 128 : i32
    %21 = arith.muli %arg1, %c128_i32 : i32
    %22 = tpu.assume_multiple %21, 128 : i32
    %c0_i32 = arith.constant 0 : i32
    %23 = arith.cmpi eq, %arg1, %c0_i32 : i32
    %24 = arith.extui %23 : i1 to i32
    %c0_i32_6 = arith.constant 0 : i32
    %25 = arith.cmpi ne, %24, %c0_i32_6 : i32
    scf.if %25 {
      %cst_20 = arith.constant 0.000000e+00 : f32
      %44 = vector.broadcast %cst_20 : f32 to vector<1x128xf32>
      %c0_21 = arith.constant 0 : index
      %c0_22 = arith.constant 0 : index
      %45 = vector.load %arg9[%c0_21, %c0_22] : memref<1x128xf32, #tpu.memory_space<vmem>>, vector<1x128xf32>
      tpu.vector_store %arg9[%c0_21, %c0_22], %44 {strides = array<i32>} : memref<1x128xf32, #tpu.memory_space<vmem>>, vector<1x128xf32>,
      %cst_23 = arith.constant 0.000000e+00 : f32
      %46 = vector.broadcast %cst_23 : f32 to vector<1x128xf32>
      %c0_24 = arith.constant 0 : index
      %c0_25 = arith.constant 0 : index
      %47 = vector.load %arg10[%c0_24, %c0_25] : memref<1x128xf32, #tpu.memory_space<vmem>>, vector<1x128xf32>
      tpu.vector_store %arg10[%c0_24, %c0_25], %46 {strides = array<i32>} : memref<1x128xf32, #tpu.memory_space<vmem>>, vector<1x128xf32>,
    } else {
    }
    %c0_7 = arith.constant 0 : index
    %c0_8 = arith.constant 0 : index
    %26 = vector.load %arg9[%c0_7, %c0_8] : memref<1x128xf32, #tpu.memory_space<vmem>>, vector<1x128xf32>
    %cst_9 = arith.constant dense<0.000000e+00> : vector<128xf32>
    %27 = vector.multi_reduction <add>, %20, %cst_9 [0] : vector<128x128xf32> to vector<128xf32>
    %28 = vector.shape_cast %27 : vector<128xf32> to vector<1x128xf32>
    %29 = arith.addf %26, %28 : vector<1x128xf32>
    %c0_10 = arith.constant 0 : index
    %c0_11 = arith.constant 0 : index
    %30 = vector.load %arg9[%c0_10, %c0_11] : memref<1x128xf32, #tpu.memory_space<vmem>>, vector<1x128xf32>
    tpu.vector_store %arg9[%c0_10, %c0_11], %29 {strides = array<i32>} : memref<1x128xf32, #tpu.memory_space<vmem>>, vector<1x128xf32>,
    %c0_12 = arith.constant 0 : index
    %c0_13 = arith.constant 0 : index
    %31 = vector.load %arg10[%c0_12, %c0_13] : memref<1x128xf32, #tpu.memory_space<vmem>>, vector<1x128xf32>
    %32 = arith.mulf %20, %20 : vector<128x128xf32>
    %cst_14 = arith.constant dense<0.000000e+00> : vector<128xf32>
    %33 = vector.multi_reduction <add>, %32, %cst_14 [0] : vector<128x128xf32> to vector<128xf32>
    %34 = vector.shape_cast %33 : vector<128xf32> to vector<1x128xf32>
    %35 = arith.addf %31, %34 : vector<1x128xf32>
    %c0_15 = arith.constant 0 : index
    %c0_16 = arith.constant 0 : index
    %36 = vector.load %arg10[%c0_15, %c0_16] : memref<1x128xf32, #tpu.memory_space<vmem>>, vector<1x128xf32>
    tpu.vector_store %arg10[%c0_15, %c0_16], %35 {strides = array<i32>} : memref<1x128xf32, #tpu.memory_space<vmem>>, vector<1x128xf32>,
    %c0_17 = arith.constant 0 : index
    %37 = arith.index_cast %22 : i32 to index
    %c0_18 = arith.constant 0 : index
    %38 = vector.load %arg8[%c0_17, %37, %c0_18] : memref<1x256x128xf32, #tpu.memory_space<vmem>>, vector<1x128x128xf32>
    %39 = vector.shape_cast %38 : vector<1x128x128xf32> to vector<128x128xf32>
    %40 = vector.shape_cast %20 : vector<128x128xf32> to vector<1x128x128xf32>
    tpu.vector_store %arg8[%c0_17, %37, %c0_18], %40 {strides = array<i32>} : memref<1x256x128xf32, #tpu.memory_space<vmem>>, vector<1x128x128xf32>,
    %c1_i32 = arith.constant 1 : i32
    %41 = arith.cmpi eq, %arg1, %c1_i32 : i32
    %42 = arith.extui %41 : i1 to i32
    %c0_i32_19 = arith.constant 0 : i32
    %43 = arith.cmpi ne, %42, %c0_i32_19 : i32
    scf.if %43 {
      %c0_20 = arith.constant 0 : index
      %c0_21 = arith.constant 0 : index
      %44 = vector.load %arg9[%c0_20, %c0_21] : memref<1x128xf32, #tpu.memory_space<vmem>>, vector<1x128xf32>
      %c0_22 = arith.constant 0 : index
      %c0_23 = arith.constant 0 : index
      %45 = vector.load %arg7[%c0_22, %c0_23] : memref<128x128xf32, #tpu.memory_space<vmem>>, vector<128x128xf32>
      %cst_24 = arith.constant dense<0.000000e+00> : vector<1x128xf32>
      %46 = tpu.matmul %44, %45, %cst_24 {dimension_numbers = #tpu.dot_dimension_numbers<[1], [0], [0], [1], [0, 0, 1, 1], [], []>} : vector<1x128xf32>, vector<128x128xf32>, vector<1x128xf32> -> vector<1x128xf32>
      %c0_25 = arith.constant 0 : index
      %c0_26 = arith.constant 0 : index
      %47 = vector.load %arg10[%c0_25, %c0_26] : memref<1x128xf32, #tpu.memory_space<vmem>>, vector<1x128xf32>
      %c0_27 = arith.constant 0 : index
      %c0_28 = arith.constant 0 : index
      %48 = vector.load %arg7[%c0_27, %c0_28] : memref<128x128xf32, #tpu.memory_space<vmem>>, vector<128x128xf32>
      %cst_29 = arith.constant dense<0.000000e+00> : vector<1x128xf32>
      %49 = tpu.matmul %47, %48, %cst_29 {dimension_numbers = #tpu.dot_dimension_numbers<[1], [0], [0], [1], [0, 0, 1, 1], [], []>} : vector<1x128xf32>, vector<128x128xf32>, vector<1x128xf32> -> vector<1x128xf32>
      %cst_30 = arith.constant 0.001953125 : f32
      %50 = vector.broadcast %cst_30 : f32 to vector<1x128xf32>
      %51 = arith.mulf %46, %50 : vector<1x128xf32>
      %cst_31 = arith.constant 0.001953125 : f32
      %52 = vector.broadcast %cst_31 : f32 to vector<1x128xf32>
      %53 = arith.mulf %49, %52 : vector<1x128xf32>
      %54 = arith.mulf %51, %51 : vector<1x128xf32>
      %55 = arith.subf %53, %54 : vector<1x128xf32>
      %cst_32 = arith.constant 9.99999974E-6 : f32
      %56 = vector.broadcast %cst_32 : f32 to vector<1x128xf32>
      %57 = arith.addf %55, %56 : vector<1x128xf32>
      %58 = math.rsqrt %57 : vector<1x128xf32>
      %c0_33 = arith.constant 0 : index
      %c0_34 = arith.constant 0 : index
      %59 = vector.load %arg5[%c0_33, %c0_34] : memref<1x128xf32, #tpu.memory_space<vmem>>, vector<1x128xf32>
      %60 = arith.mulf %59, %58 : vector<1x128xf32>
      %c0_35 = arith.constant 0 : index
      %c0_36 = arith.constant 0 : index
      %61 = vector.load %arg6[%c0_35, %c0_36] : memref<1x128xf32, #tpu.memory_space<vmem>>, vector<1x128xf32>
      %62 = arith.mulf %51, %60 : vector<1x128xf32>
      %63 = arith.subf %61, %62 : vector<1x128xf32>
      %c0_37 = arith.constant 0 : index
      %c0_38 = arith.constant 0 : index
      %c0_39 = arith.constant 0 : index
      %64 = vector.load %arg8[%c0_37, %c0_38, %c0_39] : memref<1x256x128xf32, #tpu.memory_space<vmem>>, vector<1x128x128xf32>
      %65 = vector.shape_cast %64 : vector<1x128x128xf32> to vector<128x128xf32>
      %66 = vector.broadcast %60 : vector<1x128xf32> to vector<128x128xf32>
      %67 = arith.mulf %65, %66 : vector<128x128xf32>
      %68 = vector.broadcast %63 : vector<1x128xf32> to vector<128x128xf32>
      %69 = arith.addf %67, %68 : vector<128x128xf32>
      %cst_40 = arith.constant 0.000000e+00 : f32
      %70 = vector.broadcast %cst_40 : f32 to vector<128x128xf32>
      %71 = arith.maximumf %69, %70 : vector<128x128xf32>
      %c0_41 = arith.constant 0 : index
      %c0_42 = arith.constant 0 : index
      %c0_43 = arith.constant 0 : index
      %72 = vector.load %arg8[%c0_41, %c0_42, %c0_43] : memref<1x256x128xf32, #tpu.memory_space<vmem>>, vector<1x128x128xf32>
      %73 = vector.shape_cast %72 : vector<1x128x128xf32> to vector<128x128xf32>
      %74 = vector.shape_cast %71 : vector<128x128xf32> to vector<1x128x128xf32>
      tpu.vector_store %arg8[%c0_41, %c0_42, %c0_43], %74 {strides = array<i32>} : memref<1x256x128xf32, #tpu.memory_space<vmem>>, vector<1x128x128xf32>,
      %c0_44 = arith.constant 0 : index
      %c128 = arith.constant 128 : index
      %c0_45 = arith.constant 0 : index
      %75 = vector.load %arg8[%c0_44, %c128, %c0_45] : memref<1x256x128xf32, #tpu.memory_space<vmem>>, vector<1x128x128xf32>
      %76 = vector.shape_cast %75 : vector<1x128x128xf32> to vector<128x128xf32>
      %77 = vector.broadcast %60 : vector<1x128xf32> to vector<128x128xf32>
      %78 = arith.mulf %76, %77 : vector<128x128xf32>
      %79 = vector.broadcast %63 : vector<1x128xf32> to vector<128x128xf32>
      %80 = arith.addf %78, %79 : vector<128x128xf32>
      %cst_46 = arith.constant 0.000000e+00 : f32
      %81 = vector.broadcast %cst_46 : f32 to vector<128x128xf32>
      %82 = arith.maximumf %80, %81 : vector<128x128xf32>
      %c0_47 = arith.constant 0 : index
      %c128_48 = arith.constant 128 : index
      %c0_49 = arith.constant 0 : index
      %83 = vector.load %arg8[%c0_47, %c128_48, %c0_49] : memref<1x256x128xf32, #tpu.memory_space<vmem>>, vector<1x128x128xf32>
      %84 = vector.shape_cast %83 : vector<1x128x128xf32> to vector<128x128xf32>
      %85 = vector.shape_cast %82 : vector<128x128xf32> to vector<1x128x128xf32>
      tpu.vector_store %arg8[%c0_47, %c128_48, %c0_49], %85 {strides = array<i32>} : memref<1x256x128xf32, #tpu.memory_space<vmem>>, vector<1x128x128xf32>,
    } else {
    }
    return
  }
  func.func @transform_0(%arg0: i32, %arg1: i32) -> (i32, i32, i32, i32) {
    %c0_i32 = arith.constant 0 : i32
    %c0_i32_0 = arith.constant 0 : i32
    %c0_i32_1 = arith.constant 0 : i32
    %c0_i32_2 = arith.constant 0 : i32
    return %arg0, %c0_i32, %c0_i32_0, %c0_i32_1 : i32, i32, i32, i32
  }
  func.func @transform_1(%arg0: i32, %arg1: i32) -> (i32, i32) {
    %c0_i32 = arith.constant 0 : i32
    %c0_i32_0 = arith.constant 0 : i32
    %c0_i32_1 = arith.constant 0 : i32
    return %c0_i32, %c0_i32_0 : i32, i32
  }
  func.func @transform_2(%arg0: i32, %arg1: i32) -> (i32, i32) {
    %c0_i32 = arith.constant 0 : i32
    %c0_i32_0 = arith.constant 0 : i32
    %c0_i32_1 = arith.constant 0 : i32
    return %c0_i32, %c0_i32_0 : i32, i32
  }
  func.func @transform_3(%arg0: i32, %arg1: i32) -> (i32, i32) {
    %c0_i32 = arith.constant 0 : i32
    %c0_i32_0 = arith.constant 0 : i32
    %c0_i32_1 = arith.constant 0 : i32
    return %c0_i32, %c0_i32_0 : i32, i32
  }
  func.func @transform_4(%arg0: i32, %arg1: i32) -> (i32, i32) {
    %c0_i32 = arith.constant 0 : i32
    %c0_i32_0 = arith.constant 0 : i32
    %c0_i32_1 = arith.constant 0 : i32
    return %c0_i32, %c0_i32_0 : i32, i32
  }
  func.func @transform_5(%arg0: i32, %arg1: i32) -> (i32, i32) {
    %c0_i32 = arith.constant 0 : i32
    %c0_i32_0 = arith.constant 0 : i32
    %c0_i32_1 = arith.constant 0 : i32
    return %c0_i32, %c0_i32_0 : i32, i32
  }
  func.func @transform_6(%arg0: i32, %arg1: i32) -> (i32, i32, i32) {
    %c0_i32 = arith.constant 0 : i32
    %c0_i32_0 = arith.constant 0 : i32
    %c0_i32_1 = arith.constant 0 : i32
    return %arg0, %c0_i32, %c0_i32_0 : i32, i32, i32
  }
}

</mosaic_0001>

<bundles_post_ra>
// kernel: tpu_custom_call.1
= control target key start
LH: loop header
LB: loop body
LE: loop exit
PB: predicated region body
PF: predicated region fallthrough
CT: control target
= control target key end

     0   :  { %11 = vsyncpa [#allocation5], 0  ;;  %s2689_s0 = inlined_call_operand.vmem [shape: bf16[2,18,18,4], index: 0, kind: input, shape index: {}]   ;;  %s2690_s1 = inlined_call_operand.vmem [shape: bf16[36,128], index: 1, kind: input, shape index: {}]   ;;  %s2691_s2 = inlined_call_operand.vmem [shape: f32[1,128], index: 2, kind: input, shape index: {}]   ;;  %s2692_s3 = inlined_call_operand.vmem [shape: f32[1,128], index: 3, kind: input, shape index: {}]   ;;  %s2693_s4 = inlined_call_operand.vmem [shape: f32[1,128], index: 4, kind: input, shape index: {}]   ;;  %s2694_s5 = inlined_call_operand.vmem [shape: f32[128,128], index: 5, kind: input, shape index: {}]   ;;  %s2695_s6 = inlined_call_operand.hbm [shape: f32[2,256,128], index: 6, kind: output, shape index: {}]  }
   0x1   :  { %13 = vsyncpa [#allocation5 + $0x1], 0  ;;  %s1962_s21 = smov 0   ;;  %s1964_s22 = smov 0  }
   0x2   :  { %s1966_s23 = smov 0   ;;  %s1968_s24 = smov 0  }
   0x3   :  { %s1970_s25 = smov 0   ;;  %s1972_s26 = smov 0  }
   0x4   :  { %s1974_s27 = smov 0   ;;  %s1976_s28 = smov 0  }
   0x5 LB: > { %s1462_s29 = sadd.s32 4294967295, %s1911_s28   ;;  %s1463_s30 = sadd.s32 4294967294, %s1911_s28   ;;  %s1911_s28 = sphi %s1976_s28, %s19_s28   ;;  %s1907_s27 = sphi %s1974_s27, %s2709_s27   ;;  %s1903_s26 = sphi %s1972_s26, %s2708_s26   ;;  %s1899_s25 = sphi %s1970_s25, %s2707_s25   ;;  %s1895_s24 = sphi %s1968_s24, %s2706_s24   ;;  %s1891_s23 = sphi %s1966_s23, %s2705_s23   ;;  %s1887_s22 = sphi %s1964_s22, %s2704_s22   ;;  %s1883_s21 = sphi %s1962_s21, %s2703_s21  }
   0x6   : > { %s28_s7 = sadd.s32 1, %s1903_s26  ;;  %s31_s8 = sadd.s32 1, %s1907_s27 }
   0x7   : > { %p29_p0 = scmp.ge.s32.totalorder %s28_s7, 2  ;;  %p179_p1 = scmp.ne.s32.totalorder %s1891_s23, %s1887_s22 }
   0x8   : > { %p180_p2 = scmp.eq.s32.totalorder %s1462_s29, 3  ;;  %p185_p4 = scmp.ne.s32.totalorder %s1887_s22, %s1883_s21 }
   0x9   : > { %s2711_s7 = smov (%p29_p0, %s28_s7), 0  ;;  %s2713_s8 = smov (!%p29_p0, %s31_s8), %s1907_s27 }
   0xa   : > { %p2011_p3 = por %p180_p2, %p179_p1  ;;  %p33_p5 = scmp.ge.s32.totalorder %s2713_s8, 2 }
   0xb   : > { %p186_p6 = scmp.eq.s32.totalorder %s1463_s30, 3  ;;  %p1466_p7 = scmp.ge.s32.totalorder %s1911_s28, 1 }
   0xc   : > { %p227_p8 = scmp.lt.s32.totalorder %s1911_s28, 5  ;;  %s2715_s8 = smov (%p33_p5, %s2713_s8), 0 }
   0xd   : > { %p2021_p9 = por %p186_p6, %p185_p4  ;;  %s166_s11 = ssub.s32 %s1907_s27, %s2715_s8 }
   0xe   : > { %p228_p10 = pnand %p1466_p7, %p227_p8  ;;  %s169_s12 = sadd.s32 1, %s1891_s23 }
   0xf   : > { %p167_p11 = scmp.eq.s32.totalorder %s166_s11, 0  ;;  %p257_p12 = scmp.lt.s32.totalorder (!%p228_p10), %s1899_s25, 1  ;;  %vm474_vm0 = vcmask (!%p228_p10), 1046528   ;;  %vm361_vm1 = vsmask.f32 (!%p228_p10), 7424  ;;  %vm837_vm2 = vcmask (!%p228_p10), 1041408  }
  0x10   : > { %231 = sbr.rel (%p228_p10) target bundleno = 832 (0x340), region = 44  ;;  %s1913_s29 = smov (!%p228_p10), 12   ;;  %vm657_vm3 = vcmask (!%p228_p10), 31744   ;;  %vm674_vm4 = vcmask (!%p228_p10), 64512   ;;  %vm708_vm5 = vcmask (!%p228_p10), 130048   ;;  %vm691_vm6 = vcmask (!%p228_p10), 97280  }
  0x11   : > { %s2029_s13 = scalar_select %p167_p11, %s1891_s23, %s169_s12  }
  0x12   : > { %s1512_s15 = smul.u32 (!%p228_p10), 96, %s1895_s24  ;;  %s1914_s30 = smov (!%p228_p10), 8   ;;  %vm725_vm7 = vcmask (!%p228_p10), 162816   ;;  %vm742_vm8 = vcmask (!%p228_p10), 195584   ;;  %vm759_vm9 = vcmask (!%p228_p10), 228352   ;;  %vm776_vm10 = vcmask (!%p228_p10), 261120  }
  0x13   : > { %s1915_s11 = smov (!%p228_p10), 4   ;;  %s1916_s12 = smov (!%p228_p10), 16   ;;  %vm820_vm11 = vcmask (!%p228_p10), 293888  }
  0x14   : > { %s2696_s18 = sand.u32 (!%p228_p10), 1, %s1887_s22   ;;  %s1919_s17 = smov (!%p228_p10), 28  }
  0x15   : > { %p1505_p13 = scmp.ne.s32.totalorder (!%p228_p10), %s1895_s24, 0 }
  0x17   : > { %s258_s14 = scalar_select %p257_p12, %s1899_s25, 1 }
  0x19   : > { %s1707_s16 = smul.u32 216, %s258_s14  ;;  %s2697_s14 = smov 20  }
  0x1b   : > { %s261_s19 = scalar_lea.vmem %s2689_s0, %s1707_s16 }
  0x1c   : > { %s2037_s20 = scalar_lea.vmem %s261_s19, %s1512_s15  ;;  %s1918_s15 = smov 24  }
  0x1d   : > { %v2040_v0 = vld [vmem:[%s2037_s20 + $0x3c] sm:$0xff]   ;;  %v2043_v1 = vld [vmem:[%s2037_s20 + $0xc] sm:$0xff]   ;;  %v1795_v3 = vld [vmem:[%s2037_s20 + $0x38] ss:$0 sps:$4 sm:$0x11]   ;;  %s2194_s19 = sshll.u32 %s2696_s18, 8 }
  0x1e   : > { %528 = vrot.lane.b32.xlu1 %v2040_v0, %s1913_s29  ;;  %520 = vrot.lane.b32.xlu0 %v2043_v1, %s1913_s29  ;;  %v2050_v2 = vld [vmem:[%s2037_s20 + $0x30] sm:$0xff]   ;;  %v2054_v4 = vld [vmem:[%s2037_s20] sm:$0xff]   ;;  %v490_v5 = vrot.slane %v2040_v0, 1  ;;  %v488_v7 = vrot.slane %v1795_v3, 1  ;;  %v478_v9 = vrot.slane %v2043_v1, 1  ;;  %v375_v16 = vshrl.u32 %v2043_v1, 16 }
  0x1f   : > { %v487_v6 = vrot.slane %v2050_v2, 1  ;;  %v1797_v8 = vld [vmem:[%s2037_s20 + $0x8] ss:$0 sps:$4 sm:$0x11]   ;;  %v475_v10 = vrot.slane %v2054_v4, 1  ;;  %v377_v17 = vshll.u32 %v2043_v1, 16 }
  0x20   : > { %v1798_v11 = vld [vmem:[%s2037_s20 + $0x44] ss:$0 sps:$4 sm:$0x11]   ;;  %v476_v13 = vrot.slane %v1797_v8, 1  ;;  %v363_v18 = vshrl.u32 %v2054_v4, 16  ;;  %v365_v22 = vshll.u32 %v2054_v4, 16 }
  0x21   : > { %v2063_v12 = vsel %vm474_vm0, %v487_v6, %v488_v7  ;;  %v1799_v14 = vld [vmem:[%s2037_s20 + $0x14] ss:$0 sps:$4 sm:$0x11]   ;;  %v491_v15 = vrot.slane %v1798_v11, 1  ;;  %v379_v24 = vrot.slane %v377_v17, 1  ;;  %v370_v25 = vshll.u32 %v1797_v8, 16 }
  0x22   : > { %507 = vrot.lane.b32.xlu1 %v2063_v12, %s1914_s30  ;;  %v477_v19 = vsel %vm474_vm0, %v475_v10, %v476_v13  ;;  %v479_v20 = vrot.slane %v1799_v14, 1  ;;  %v382_v21 = vshll.u32 %v1799_v14, 16  ;;  %v423_v26 = vshrl.u32 %v2040_v0, 16  ;;  %v2087_v39 = vld [vmem:[%s2037_s20 + $0x48] sm:$0xff]   ;;  %v2094_v46 = vld [vmem:[%s2037_s20 + $0x18] sm:$0xff]   ;;  %v2112_v57 = vld [vmem:[%s2037_s20 + $0x60] sm:$0xff]  }
  0x23   : > { %499 = vrot.lane.b32.xlu0 %v477_v19, %s1914_s30  ;;  %v2075_v23 = vsel %vm474_vm0, %v490_v5, %v491_v15  ;;  %v367_v29 = vrot.slane %v365_v22, 1  ;;  %v425_v30 = vshll.u32 %v2040_v0, 16  ;;  %v380_v31 = vor.u32 %v379_v24, %v375_v16  ;;  %v1802_v47 = vld [vmem:[%s2037_s20 + $0x50] ss:$0 sps:$4 sm:$0x11]  }
  0x24   : > { %v2079_v27 = vsel %vm474_vm0, %v478_v9, %v479_v20  ;;  %v384_v28 = vrot.slane %v382_v21, 1  ;;  %v372_v32 = vrot.slane %v370_v25, 1  ;;  %v430_v33 = vshll.u32 %v1798_v11, 16  ;;  %v1803_v51 = vld [vmem:[%s2037_s20 + $0x20] ss:$0 sps:$4 sm:$0x11]  }
  0x25   : > { %v411_v34 = vshrl.u32 %v2050_v2, 16  ;;  %v368_v35 = vor.u32 %v367_v29, %v363_v18  ;;  %v427_v36 = vrot.slane %v425_v30, 1  ;;  %v413_v37 = vshll.u32 %v2050_v2, 16  ;;  %v2120_v61 = vld [vmem:[%s2037_s20 + $0x6c] sm:$0xff]  }
  0x26   : > { %509 = vrot.lane.b32.xlu1 %v2075_v23, %s1914_s30  ;;  %v418_v38 = vshll.u32 %v1795_v3, 16  ;;  %v385_v40 = vsel %vm361_vm1, %v380_v31, %v384_v28  ;;  %v432_v41 = vrot.slane %v430_v33, 1  ;;  %v437_v50 = vshll.u32 %v2087_v39, 16  ;;  %v1809_v3 = vld [vmem:[%s2037_s20 + $0x68] ss:$0 sps:$4 sm:$0x11]  }
  0x27   : > { %501 = vrot.lane.b32.xlu0 %v2079_v27, %s1914_s30  ;;  %v373_v42 = vsel %vm361_vm1, %v368_v35, %v372_v32  ;;  %v428_v43 = vor.u32 %v427_v36, %v423_v26  ;;  %v415_v44 = vrot.slane %v413_v37, 1  ;;  %v389_v53 = vshll.u32 %v2094_v46, 16  ;;  %v1811_v15 = vld [vmem:[%s2037_s20 + $0x74] ss:$0 sps:$4 sm:$0x11]  }
  0x28   : > { %v420_v45 = vrot.slane %v418_v38, 1  ;;  %v435_v54 = vshrl.u32 %v2087_v39, 16  ;;  %v439_v55 = vrot.slane %v437_v50, 1  ;;  %v442_v56 = vshll.u32 %v1802_v47, 16  ;;  %v2165_v38 = vld [vmem:[%s2037_s20 + $0x54] sm:$0xff]  }
  0x29   : > { %v2099_v48 = vsel %vm361_vm1, %v428_v43, %v432_v41  ;;  %v416_v49 = vor.u32 %v415_v44, %v411_v34  ;;  %v394_v58 = vshll.u32 %v1803_v51, 16  ;;  %v387_v59 = vshrl.u32 %v2094_v46, 16  ;;  %v2173_v41 = vld [vmem:[%s2037_s20 + $0x24] sm:$0xff]   ;;  %v1807_v44 = vld [vmem:[%s2037_s20 + $0x2c] ss:$0 sps:$4 sm:$0x11]  }
  0x2a   : > { %460 = vrot.lane.b32.xlu1 %v385_v40, %s1915_s11  ;;  %v391_v60 = vrot.slane %v389_v53, 1  ;;  %v440_v62 = vor.u32 %v439_v55, %v435_v54  ;;  %v444_v63 = vrot.slane %v442_v56, 1  ;;  %v540_v5 = vshrl.u32 %v2112_v57, 16  ;;  %v1813_v55 = vld [vmem:[%s2690_s1 + $0x8] sm:$0xff]  }
  0x2b   : > { %458 = vrot.lane.b32.xlu0 %v373_v42, %s1915_s11  ;;  %v2105_v52 = vsel %vm361_vm1, %v416_v49, %v420_v45  ;;  %v542_v6 = vshll.u32 %v2112_v57, 16  ;;  %v396_v7 = vrot.slane %v394_v58, 1  ;;  %v567_v8 = vrot.slane %v2112_v57, 1  ;;  %v1806_v42 = vld [vmem:[%s2037_s20 + $0x5c] ss:$0 sps:$4 sm:$0x11]  }
  0x2c   : > { %v392_v9 = vor.u32 %v391_v60, %v387_v59  ;;  %v547_v11 = vshll.u32 %v1809_v3, 16  ;;  %v611_v13 = vshrl.u32 %v2120_v61, 16  ;;  %v568_v14 = vrot.slane %v1809_v3, 1  ;;  %s1920_s20 = smov 32  }
  0x2d   : > { %v544_v10 = vrot.slane %v542_v6, 1  ;;  %v613_v16 = vshll.u32 %v2120_v61, 16  ;;  %v638_v17 = vrot.slane %v2120_v61, 1  ;;  %v2135_v18 = vsel %vm361_vm1, %v440_v62, %v444_v63  ;;  %v1814_v62 = vld [vmem:[%s2690_s1 + $0x10] ss:$0 sps:$4 sm:$0x33]  }
  0x2e   : > { %468 = vrot.lane.b32.xlu1 %v2099_v48, %s1915_s11  ;;  %v549_v20 = vrot.slane %v547_v11, 1  ;;  %v2139_v21 = vsel %vm474_vm0, %v567_v8, %v568_v14  ;;  %v618_v24 = vshll.u32 %v1811_v15, 16  ;;  %v639_v25 = vrot.slane %v1811_v15, 1 }
  0x2f   : > { %466 = vrot.lane.b32.xlu0 %v2105_v52, %s1915_s11  ;;  %v545_v19 = vor.u32 %v544_v10, %v540_v5  ;;  %v615_v22 = vrot.slane %v613_v16, 1  ;;  %v2142_v26 = vsel %vm361_vm1, %v392_v9, %v396_v7  ;;  %v493_v32 = vrot.slane %v2087_v39, 1 }
  0x30   : > { %v620_v30 = vrot.slane %v618_v24, 1  ;;  %v2150_v31 = vsel %vm474_vm0, %v638_v17, %v639_v25  ;;  %v494_v33 = vrot.slane %v1802_v47, 1  ;;  %v481_v35 = vrot.slane %v2094_v46, 1 }
  0x31   : > { %v2145_v28 = vsel %vm361_vm1, %v545_v19, %v549_v20  ;;  %v616_v29 = vor.u32 %v615_v22, %v611_v13  ;;  %v482_v36 = vrot.slane %v1803_v51, 1  ;;  %v449_v43 = vshll.u32 %v2165_v38, 16 }
  0x32   : > { %530 = vrot.lane.b32.xlu1 %v2087_v39, %s1913_s29  ;;  %v2162_v37 = vsel %vm474_vm0, %v493_v32, %v494_v33  ;;  %v401_v45 = vshll.u32 %v2173_v41, 16  ;;  %v447_v47 = vshrl.u32 %v2165_v38, 16  ;;  %v454_v50 = vshll.u32 %v1806_v42, 16 }
  0x33   : > { %522 = vrot.lane.b32.xlu0 %v2094_v46, %s1913_s29  ;;  %v2156_v34 = vsel %vm361_vm1, %v616_v29, %v620_v30  ;;  %v451_v49 = vrot.slane %v449_v43, 1  ;;  %v399_v51 = vshrl.u32 %v2173_v41, 16  ;;  %v406_v54 = vshll.u32 %v1807_v44, 16 }
  0x34   : > { %v403_v53 = vrot.slane %v401_v45, 1  ;;  %v456_v58 = vrot.slane %v454_v50, 1  ;;  %v839_v3 = vsel %vm837_vm2, %v1814_v62, 0  ;;  %v496_v6 = vrot.slane %v2165_v38, 1 }
  0x35   : > { %v452_v56 = vor.u32 %v451_v49, %v447_v47  ;;  %v408_v60 = vrot.slane %v406_v54, 1  ;;  %v497_v7 = vrot.slane %v1806_v42, 1  ;;  %v484_v8 = vrot.slane %v2173_v41, 1 }
  0x36   : > { %559 = vrot.lane.b32.xlu1 %v2099_v48, %s1916_s12  ;;  %v404_v59 = vor.u32 %v403_v53, %v399_v51  ;;  %v485_v9 = vrot.slane %v1807_v44, 1 }
  0x37   : > { %551 = vrot.lane.b32.xlu0 %v385_v40, %s1916_s12  ;;  %v2170_v40 = vsel %vm474_vm0, %v481_v35, %v482_v36  ;;  %v457_v63 = vsel %vm361_vm1, %v452_v56, %v456_v58  ;;  %v498_v10 = vsel %vm474_vm0, %v496_v6, %v497_v7 }
  0x38   : > { %v409_v5 = vsel %vm361_vm1, %v404_v59, %v408_v60  ;;  %v486_v11 = vsel %vm474_vm0, %v484_v8, %v485_v9 }
  0x3a   : > { %561 = vrot.lane.b32.xlu1 %v2135_v18, %s1916_s12 }
  0x3b   : > { %553 = vrot.lane.b32.xlu0 %v2142_v26, %s1916_s12 }
  0x3e   : > { %578 = vrot.lane.b32.xlu1 %v2075_v23, %s2697_s14 }
  0x3f   : > { %570 = vrot.lane.b32.xlu0 %v2079_v27, %s2697_s14  ;;  %v1812_v27 = vld [vmem:[%s2690_s1] sm:$0xff]  }
  0x40   : > { %1559 = vmatprep.subr.bf16.mxu0 %v1812_v27  ;;  %1699 = vmatprep.subr.bf16.mxu1 %v1812_v27 }
  0x41   : > { %1560 = vmatpush3.bf16.msra.mxu0 %v1812_v27  ;;  %1702 = vmatpush3.bf16.msra.mxu1 %v1812_v27 }
  0x42   : > { %580 = vrot.lane.b32.xlu1 %v2162_v37, %s2697_s14  ;;  %1561 = vmatprep.subr.bf16.mxu0 %v1813_v55 }
  0x43   : > { %572 = vrot.lane.b32.xlu0 %v2170_v40, %s2697_s14  ;;  %1700 = vmatprep.subr.bf16.mxu1 %v1813_v55 }
  0x45   : > { %1562 = vmatpush3.bf16.msra.mxu0 %v1813_v55  ;;  %1703 = vmatpush3.bf16.msra.mxu1 %v1813_v55 }
  0x46   : > { %599 = vrot.lane.b32.xlu1 %v2087_v39, %s1918_s15  ;;  %1705 = vmatprep.subr.msk.bf16.mxu0 %vm837_vm2, %v1814_v62 }
  0x47   : > { %591 = vrot.lane.b32.xlu0 %v2094_v46, %s1918_s15  ;;  %1706 = vmatprep.subr.msk.bf16.mxu1 %vm837_vm2, %v1814_v62 }
  0x49   : > { %1564 = vmatpush3.bf16.msra.mxu0 %v839_v3  ;;  %1704 = vmatpush3.bf16.msra.mxu1 %v839_v3 }
  0x4a   : > { %601 = vrot.lane.b32.xlu1 %v2165_v38, %s1918_s15 }
  0x4b   : > { %593 = vrot.lane.b32.xlu0 %v2173_v41, %s1918_s15 }
  0x4e   : > { %630 = vrot.lane.b32.xlu1 %v2135_v18, %s1919_s17 }
  0x4f   : > { %622 = vrot.lane.b32.xlu0 %v2142_v26, %s1919_s17 }
  0x52   : > { %632 = vrot.lane.b32.xlu1 %v457_v63, %s1919_s17 }
  0x53   : > { %624 = vrot.lane.b32.xlu0 %v409_v5, %s1919_s17 }
  0x56   : > { %649 = vrot.lane.b32.xlu1 %v2162_v37, %s1920_s20 }
  0x57   : > { %641 = vrot.lane.b32.xlu0 %v2170_v40, %s1920_s20 }
  0x5a   : > { %470 = vrot.lane.b32.xlu1 %v2135_v18, %s1915_s11 }
  0x5b   : > { %462 = vrot.lane.b32.xlu0 %v2142_v26, %s1915_s11 }
  0x5e   : > { %651 = vrot.lane.b32.xlu1 %v498_v10, %s1920_s20 }
  0x5f   : > { %643 = vrot.lane.b32.xlu0 %v486_v11, %s1920_s20 }
  0x62   : > { %472 = vrot.lane.b32.xlu1 %v457_v63, %s1915_s11 }
  0x63   : > { %464 = vrot.lane.b32.xlu0 %v409_v5, %s1915_s11  ;;  %s2701_s11 = smov 20  }
  0x66   : > { %511 = vrot.lane.b32.xlu1 %v2162_v37, %s1914_s30 }
  0x67   : > { %503 = vrot.lane.b32.xlu0 %v2170_v40, %s1914_s30 }
  0x6a   : > { %513 = vrot.lane.b32.xlu1 %v498_v10, %s1914_s30 }
  0x6b   : > { %505 = vrot.lane.b32.xlu0 %v486_v11, %s1914_s30 }
  0x6e   : > { %532 = vrot.lane.b32.xlu1 %v2165_v38, %s1913_s29 }
  0x6f   : > { %524 = vrot.lane.b32.xlu0 %v2173_v41, %s1913_s29 }
  0x72   : > { %534 = vrot.lane.b32.xlu1 %v2112_v57, %s1913_s29 }
  0x73   : > { %526 = vrot.lane.b32.xlu0 %v2050_v2, %s1913_s29  ;;  %s1504_s29 = sshll.u32 %s1895_s24, 7 }
  0x76   : > { %563 = vrot.lane.b32.xlu1 %v457_v63, %s1916_s12 }
  0x77   : > { %555 = vrot.lane.b32.xlu0 %v409_v5, %s1916_s12 }
  0x7a   : > { %565 = vrot.lane.b32.xlu1 %v2145_v28, %s1916_s12 }
  0x7b   : > { %557 = vrot.lane.b32.xlu0 %v2105_v52, %s1916_s12 }
  0x7e   : > { %582 = vrot.lane.b32.xlu1 %v498_v10, %s2701_s11 }
  0x7f   : > { %574 = vrot.lane.b32.xlu0 %v486_v11, %s2701_s11 }
  0x82   : > { %584 = vrot.lane.b32.xlu1 %v2139_v21, %s2701_s11 }
  0x83   : > { %576 = vrot.lane.b32.xlu0 %v2063_v12, %s2701_s11 }
  0x86   : > { %603 = vrot.lane.b32.xlu1 %v2112_v57, %s1918_s15 }
  0x87   : > { %595 = vrot.lane.b32.xlu0 %v2050_v2, %s1918_s15 }
  0x8a   : > { %605 = vrot.lane.b32.xlu1 %v2120_v61, %s1918_s15 }
  0x8b   : > { %597 = vrot.lane.b32.xlu0 %v2040_v0, %s1918_s15  ;;  %s2382_s15 = scalar_lea.vmem [#allocation4], %s2194_s19 }
  0x8e   : > { %634 = vrot.lane.b32.xlu1 %v2145_v28, %s1919_s17 }
  0x8f   : > { %626 = vrot.lane.b32.xlu0 %v2105_v52, %s1919_s17 }
  0x90   : > { %v529_v13 = vpop.permute.xlu1 %528  ;;  %v521_v14 = vpop.permute.xlu0 %520 }
  0x92   : > { %636 = vrot.lane.b32.xlu1 %v2156_v34, %s1919_s17 }
  0x93   : > { %628 = vrot.lane.b32.xlu0 %v2099_v48, %s1919_s17 }
  0x94   : > { %v508_v57 = vpop.permute.xlu1 %507 }
  0x95   : > { %v500_v15 = vpop.permute.xlu0 %499 }
  0x96   : > { %653 = vrot.lane.b32.xlu1 %v2139_v21, %s1920_s20 }
  0x97   : > { %645 = vrot.lane.b32.xlu0 %v2063_v12, %s1920_s20 }
  0x98   : > { %v510_v61 = vpop.permute.xlu1 %509 }
  0x99   : > { %v502_v16 = vpop.permute.xlu0 %501 }
  0x9a   : > { %655 = vrot.lane.b32.xlu1 %v2150_v31, %s1920_s20 }
  0x9b   : > { %647 = vrot.lane.b32.xlu0 %v2075_v23, %s1920_s20 }
  0x9c   : > { %v461_v52 = vpop.permute.xlu1 %460 }
  0x9d   : > { %v459_v17 = vpop.permute.xlu0 %458  ;;  %v661_v56 = vsel %vm657_vm3, %v2043_v1, %v461_v52 }
  0x9e   : > { %v659_v34 = vsel %vm657_vm3, %v2054_v4, %v459_v17  ;;  %v678_v3 = vsel %vm674_vm4, %v661_v56, %v502_v16 }
  0x9f   : > { %v676_v40 = vsel %vm674_vm4, %v659_v34, %v500_v15 }
  0xa0   : > { %v469_v18 = vpop.permute.xlu1 %468  ;;  %v693_v44 = vsel %vm691_vm6, %v676_v40, %v521_v14 }
  0xa1   : > { %v467_v48 = vpop.permute.xlu0 %466  ;;  %v669_v49 = vsel %vm657_vm3, %v2040_v0, %v469_v18 }
  0xa2   : > { %v667_v23 = vsel %vm657_vm3, %v2050_v2, %v467_v48  ;;  %v686_v60 = vsel %vm674_vm4, %v669_v49, %v510_v61 }
  0xa3   : > { %v684_v36 = vsel %vm674_vm4, %v667_v23, %v508_v57 }
  0xa4   : > { %v531_v19 = vpop.permute.xlu1 %530  ;;  %v701_v42 = vsel %vm691_vm6, %v684_v36, %v529_v13 }
  0xa5   : > { %v523_v20 = vpop.permute.xlu0 %522  ;;  %v703_v62 = vsel %vm691_vm6, %v686_v60, %v531_v19 }
  0xa6   : > { %v695_v1 = vsel %vm691_vm6, %v678_v3, %v523_v20 }
  0xa8   : > { %v560_v22 = vpop.permute.xlu1 %559 }
  0xa9   : > { %v552_v24 = vpop.permute.xlu0 %551  ;;  %v718_v2 = vsel %vm708_vm5, %v701_v42, %v560_v22 }
  0xaa   : > { %v710_v27 = vsel %vm708_vm5, %v693_v44, %v552_v24 }
  0xac   : > { %v562_v21 = vpop.permute.xlu1 %561 }
  0xad   : > { %v554_v25 = vpop.permute.xlu0 %553  ;;  %v720_v5 = vsel %vm708_vm5, %v703_v62, %v562_v21 }
  0xae   : > { %v712_v8 = vsel %vm708_vm5, %v695_v1, %v554_v25 }
  0xb0   : > { %v579_v26 = vpop.permute.xlu1 %578 }
  0xb1   : > { %v571_v12 = vpop.permute.xlu0 %570  ;;  %v735_v4 = vsel %vm725_vm7, %v718_v2, %v579_v26 }
  0xb2   : > { %v727_v50 = vsel %vm725_vm7, %v710_v27, %v571_v12 }
  0xb4   : > { %v581_v28 = vpop.permute.xlu1 %580 }
  0xb5   : > { %v573_v29 = vpop.permute.xlu0 %572  ;;  %v737_v6 = vsel %vm725_vm7, %v720_v5, %v581_v28 }
  0xb6   : > { %v729_v10 = vsel %vm725_vm7, %v712_v8, %v573_v29 }
  0xb8   : > { %v600_v30 = vpop.permute.xlu1 %599 }
  0xb9   : > { %v592_v32 = vpop.permute.xlu0 %591  ;;  %v752_v47 = vsel %vm742_vm8, %v735_v4, %v600_v30 }
  0xba   : > { %v744_v54 = vsel %vm742_vm8, %v727_v50, %v592_v32 }
  0xbc   : > { %v602_v31 = vpop.permute.xlu1 %601 }
  0xbd   : > { %v594_v33 = vpop.permute.xlu0 %593  ;;  %v754_v9 = vsel %vm742_vm8, %v737_v6, %v602_v31 }
  0xbe   : > { %v746_v14 = vsel %vm742_vm8, %v729_v10, %v594_v33 }
  0xc0   : > { %v631_v35 = vpop.permute.xlu1 %630 }
  0xc1   : > { %v623_v37 = vpop.permute.xlu0 %622  ;;  %v769_v51 = vsel %vm759_vm9, %v752_v47, %v631_v35 }
  0xc2   : > { %v761_v58 = vsel %vm759_vm9, %v744_v54, %v623_v37 }
  0xc4   : > { %v633_v43 = vpop.permute.xlu1 %632 }
  0xc5   : > { %v625_v45 = vpop.permute.xlu0 %624  ;;  %v771_v11 = vsel %vm759_vm9, %v754_v9, %v633_v43 }
  0xc6   : > { %v763_v15 = vsel %vm759_vm9, %v746_v14, %v625_v45 }
  0xc8   : > { %v650_v53 = vpop.permute.xlu1 %649 }
  0xc9   : > { %v786_v55 = vsel %vm776_vm10, %v769_v51, %v650_v53  ;;  %v642_v59 = vpop.permute.xlu0 %641 }
  0xca   : > { %1573 = vmatprep.mubr.msk.bf16.mxu1 %vm820_vm11, %v786_v55  ;;  %v778_v0 = vsel %vm776_vm10, %v761_v58, %v642_v59 }
  0xcb   : > { %1565 = vmatprep.mubr.msk.bf16.mxu0 %vm820_vm11, %v778_v0 }
  0xcc   : > { %v471_v63 = vpop.permute.xlu1 %470 }
  0xcd   : > { %v463_v7 = vpop.permute.xlu0 %462  ;;  %v671_v40 = vsel %vm657_vm3, %v2087_v39, %v471_v63 }
  0xce   : > { %v663_v2 = vsel %vm657_vm3, %v2094_v46, %v463_v7 }
  0xd0   : > { %v652_v13 = vpop.permute.xlu1 %651 }
  0xd1   : > { %v788_v57 = vsel %vm776_vm10, %v771_v11, %v652_v13  ;;  %v644_v61 = vpop.permute.xlu0 %643 }
  0xd2   : > { %1574 = vmatmul.mubr.msk.bf16.vlgmr.msra.gmra.mrb[0].mxu1 %vm820_vm11, %v788_v57  ;;  %v780_v16 = vsel %vm776_vm10, %v763_v15, %v644_v61  ;;  %v1492_v61 = vld [vmem:[%s2691_s2] ss:$0 sm:$0xff] }
  0xd3   : > { %1566 = vmatmul.mubr.msk.bf16.vlgmr.msra.gmra.mrb[0].mxu0 %vm820_vm11, %v780_v16 }
  0xd4   : > { %v473_v52 = vpop.permute.xlu1 %472 }
  0xd5   : > { %v465_v17 = vpop.permute.xlu0 %464  ;;  %v673_v47 = vsel %vm657_vm3, %v2165_v38, %v473_v52 }
  0xd6   : > { %v665_v54 = vsel %vm657_vm3, %v2173_v41, %v465_v17 }
  0xd8   : > { %v512_v18 = vpop.permute.xlu1 %511 }
  0xd9   : > { %v504_v48 = vpop.permute.xlu0 %503  ;;  %v688_v43 = vsel %vm674_vm4, %v671_v40, %v512_v18 }
  0xda   : > { %v680_v45 = vsel %vm674_vm4, %v663_v2, %v504_v48 }
  0xdc   : > { %v514_v19 = vpop.permute.xlu1 %513 }
  0xdd   : > { %v506_v20 = vpop.permute.xlu0 %505  ;;  %v690_v51 = vsel %vm674_vm4, %v673_v47, %v514_v19  ;;  %v1921_v47 = vmov (!%p1505_p13), 0.0  }
  0xde   : > { %v682_v59 = vsel %vm674_vm4, %v665_v54, %v506_v20  ;;  %943 = vst [vmem:[#allocation2] sm:$0x1] (!%p1505_p13), %v1921_v47  ;;  %944 = vst [vmem:[#allocation3] sm:$0x1] (!%p1505_p13), %v1921_v47 }
  0xe0   : > { %v533_v22 = vpop.permute.xlu1 %532 }
  0xe1   : > { %v525_v24 = vpop.permute.xlu0 %524  ;;  %v705_v44 = vsel %vm691_vm6, %v688_v43, %v533_v22 }
  0xe2   : > { %v697_v49 = vsel %vm691_vm6, %v680_v45, %v525_v24 }
  0xe4   : > { %v535_v21 = vpop.permute.xlu1 %534 }
  0xe5   : > { %v527_v25 = vpop.permute.xlu0 %526  ;;  %v707_v55 = vsel %vm691_vm6, %v690_v51, %v535_v21 }
  0xe6   : > { %v699_v63 = vsel %vm691_vm6, %v682_v59, %v527_v25 }
  0xe8   : > { %v564_v26 = vpop.permute.xlu1 %563 }
  0xe9   : > { %v556_v12 = vpop.permute.xlu0 %555  ;;  %v722_v27 = vsel %vm708_vm5, %v705_v44, %v564_v26 }
  0xea   : > { %v714_v53 = vsel %vm708_vm5, %v697_v49, %v556_v12 }
  0xec   : > { %v566_v28 = vpop.permute.xlu1 %565 }
  0xed   : > { %v558_v29 = vpop.permute.xlu0 %557  ;;  %v724_v60 = vsel %vm708_vm5, %v707_v55, %v566_v28 }
  0xee   : > { %v716_v1 = vsel %vm708_vm5, %v699_v63, %v558_v29 }
  0xf0   : > { %v583_v30 = vpop.permute.xlu1 %582 }
  0xf1   : > { %v575_v32 = vpop.permute.xlu0 %574  ;;  %v739_v39 = vsel %vm725_vm7, %v722_v27, %v583_v30 }
  0xf2   : > { %v731_v56 = vsel %vm725_vm7, %v714_v53, %v575_v32 }
  0xf4   : > { %v585_v31 = vpop.permute.xlu1 %584 }
  0xf5   : > { %v577_v23 = vpop.permute.xlu0 %576  ;;  %v741_v3 = vsel %vm725_vm7, %v724_v60, %v585_v31 }
  0xf6   : > { %v733_v8 = vsel %vm725_vm7, %v716_v1, %v577_v23 }
  0xf8   : > { %v604_v33 = vpop.permute.xlu1 %603 }
  0xf9   : > { %v596_v34 = vpop.permute.xlu0 %595  ;;  %v756_v46 = vsel %vm742_vm8, %v739_v39, %v604_v33 }
  0xfa   : > { %v748_v0 = vsel %vm742_vm8, %v731_v56, %v596_v34 }
  0xfc   : > { %v606_v35 = vpop.permute.xlu1 %605 }
  0xfd   : > { %v598_v36 = vpop.permute.xlu0 %597  ;;  %v758_v6 = vsel %vm742_vm8, %v741_v3, %v606_v35 }
  0xfe   : > { %v750_v11 = vsel %vm742_vm8, %v733_v8, %v598_v36 }
 0x100   : > { %v635_v37 = vpop.permute.xlu1 %634 }
 0x101   : > { %v627_v42 = vpop.permute.xlu0 %626  ;;  %v773_v38 = vsel %vm759_vm9, %v756_v46, %v635_v37 }
 0x102   : > { %v765_v41 = vsel %vm759_vm9, %v748_v0, %v627_v42 }
 0x104   : > { %v637_v4 = vpop.permute.xlu1 %636 }
 0x105   : > { %v629_v50 = vpop.permute.xlu0 %628  ;;  %v775_v9 = vsel %vm759_vm9, %v758_v6, %v637_v4 }
 0x106   : > { %v767_v14 = vsel %vm759_vm9, %v750_v11, %v629_v50 }
 0x108   : > { %v654_v58 = vpop.permute.xlu1 %653 }
 0x109   : > { %v790_v62 = vsel %vm776_vm10, %v773_v38, %v654_v58  ;;  %v646_v5 = vpop.permute.xlu0 %645 }
 0x10a   : > { %1577 = vmatprep.mubr.msk.bf16.mxu1 %vm820_vm11, %v790_v62  ;;  %v782_v7 = vsel %vm776_vm10, %v765_v41, %v646_v5 }
 0x10b   : > { %1569 = vmatprep.mubr.msk.bf16.mxu0 %vm820_vm11, %v782_v7 }
 0x10c   : > { %v656_v10 = vpop.permute.xlu1 %655 }
 0x10d   : > { %v792_v13 = vsel %vm776_vm10, %v775_v9, %v656_v10  ;;  %v648_v57 = vpop.permute.xlu0 %647 }
 0x10e   : > { %1578 = vmatmul.mubr.msk.bf16.gmra.mrb[4].mxu1 %vm820_vm11, %v792_v13  ;;  %v784_v15 = vsel %vm776_vm10, %v767_v14, %v648_v57 }
 0x10f   : > { %1570 = vmatmul.mubr.msk.bf16.gmra.mrb[4].mxu0 %vm820_vm11, %v784_v15 }
 0x1a5   : > { %v1575_v16 = vpop.f32.mrb[0].mxu1 }
 0x1a6   : > { %v2365_v52 = vadd.f32 %v1575_v16, %v1492_v61  ;;  %v907_v17 = vpop.f32.mrb[1].mxu1  ;;  %v1567_v18 = vpop.f32.mrb[0].mxu0 }
 0x1a7   : > { %v2367_v48 = vadd.f32 %v1492_v61, %v907_v17  ;;  %v1576_v19 = vpop.f32.mrb[2].mxu1  ;;  %v884_v20 = vadd.f32 %v1567_v18, %v1492_v61  ;;  %v875_v22 = vpop.f32.mrb[1].mxu0 }
 0x1a8   : > { %v2369_v24 = vadd.f32 %v1576_v19, %v1492_v61  ;;  %v910_v21 = vpop.f32.mrb[3].mxu1  ;;  %v876_v25 = vadd.f32 %v1492_v61, %v875_v22  ;;  %v1568_v26 = vpop.f32.mrb[2].mxu0 }
 0x1a9   : > { %v2371_v12 = vadd.f32 %v1492_v61, %v910_v21  ;;  %v887_v28 = vadd.f32 %v1568_v26, %v1492_v61  ;;  %v878_v29 = vpop.f32.mrb[3].mxu0 }
 0x1aa   : > { %v879_v30 = vadd.f32 %v1492_v61, %v878_v29 }
 0x1e0   : > { %942 = sbr.rel (%p1505_p13) target bundleno = 487 (0x1e7), region = 48 }
 0x1e1   : > { %v1579_v32 = vpop.f32.mrb[4].mxu1 }
 0x1e2   : > { %v2373_v31 = vadd.f32 %v1579_v32, %v1492_v61  ;;  %v923_v23 = vpop.f32.mrb[5].mxu1  ;;  %v1571_v33 = vpop.f32.mrb[4].mxu0 }
 0x1e3   : > { %v2375_v34 = vadd.f32 %v1492_v61, %v923_v23  ;;  %v1580_v35 = vpop.f32.mrb[6].mxu1  ;;  %v900_v36 = vadd.f32 %v1571_v33, %v1492_v61  ;;  %v891_v37 = vpop.f32.mrb[5].mxu0 }
 0x1e4   : > { %v2377_v40 = vadd.f32 %v1580_v35, %v1492_v61  ;;  %v926_v42 = vpop.f32.mrb[7].mxu1  ;;  %v892_v43 = vadd.f32 %v1492_v61, %v891_v37  ;;  %v1572_v2 = vpop.f32.mrb[6].mxu0 }
 0x1e5   : > { %v2379_v44 = vadd.f32 %v1492_v61, %v926_v42  ;;  %v903_v4 = vadd.f32 %v1572_v2, %v1492_v61  ;;  %v894_v45 = vpop.f32.mrb[7].mxu0 }
 0x1e6   : > { %v895_v27 = vadd.f32 %v1492_v61, %v894_v45 }
 0x1e7 PF: > { %v946_v49 = vadd.f32 %v879_v30, %v876_v25  ;;  %v970_v39 = vmul.f32 %v876_v25, %v876_v25  ;;  %v971_v50 = vmul.f32 %v879_v30, %v879_v30  ;;  %s1009_s18 = scalar_lea.vmem %s2382_s15, %s1504_s29 [#allocation4]  ;;  %v972_v53 = vmul.f32 %v884_v20, %v884_v20  ;;  %v945_v42 = vld [vmem:[#allocation2] sm:$0x1]  ;;  %p1506_p0 = scmp.ne.s32.totalorder %s1895_s24, 1 }
 0x1e8   : > { %1010 = vst [vmem:[%s1009_s18] sm:$0xff] %v876_v25  ;;  %1011 = vst [vmem:[%s1009_s18 + $0x8] sm:$0xff] %v879_v30  ;;  %v973_v54 = vmul.f32 %v887_v28, %v887_v28  ;;  %v974_v38 = vmul.f32 %v892_v43, %v892_v43  ;;  %v975_v60 = vmul.f32 %v895_v27, %v895_v27  ;;  %v1032_v47 = vld [vmem:[%s2694_s5 + $0x8] sm:$0xff] (!%p1506_p0)  ;;  %vm1923_vm12 = vmmov (!%p1506_p0), 0  }
 0x1e9   : > { %1012 = vst [vmem:[%s1009_s18 + $0x10] sm:$0xff] %v884_v20  ;;  %1013 = vst [vmem:[%s1009_s18 + $0x18] sm:$0xff] %v887_v28  ;;  %v947_v51 = vadd.f32 %v946_v49, %v884_v20  ;;  %v986_v55 = vadd.f32 %v971_v50, %v970_v39  ;;  %v976_v63 = vmul.f32 %v900_v36, %v900_v36  ;;  %v1033_v49 = vld [vmem:[%s2694_s5 + $0x10] sm:$0xff] (!%p1506_p0)  ;;  %v1922_v39 = vmov (!%p1506_p0), 0.0|0.0  }
 0x1ea   : > { %1014 = vst [vmem:[%s1009_s18 + $0x20] sm:$0xff] %v892_v43  ;;  %1015 = vst [vmem:[%s1009_s18 + $0x28] sm:$0xff] %v895_v27  ;;  %v977_v5 = vmul.f32 %v903_v4, %v903_v4  ;;  %v978_v7 = vmul.f32 %v2367_v48, %v2367_v48  ;;  %v979_v10 = vmul.f32 %v2371_v12, %v2371_v12  ;;  %1651 = vmatprep.subr.bf16.mxu0 (!%p1506_p0), %v1922_v39 }
 0x1eb   : > { %1016 = vst [vmem:[%s1009_s18 + $0x30] sm:$0xff] %v900_v36  ;;  %1017 = vst [vmem:[%s1009_s18 + $0x38] sm:$0xff] %v903_v4  ;;  %v948_v46 = vadd.f32 %v947_v51, %v887_v28  ;;  %v987_v58 = vadd.f32 %v986_v55, %v972_v53  ;;  %v980_v14 = vmul.f32 %v2365_v52, %v2365_v52  ;;  %1675 = vmatprep.subr.bf16.mxu1 (!%p1506_p0), %v1922_v39  ;;  %v1034_v51 = vld [vmem:[%s2694_s5 + $0x18] sm:$0xff] (!%p1506_p0)  ;;  %v1924_v53 = vmov (!%p1506_p0), 0.0   ;;  %v1036_v55 = vld [vmem:[%s2694_s5 + $0x28] sm:$0xff] (!%p1506_p0) }
 0x1ec   : > { %1018 = vst [vmem:[%s1009_s18 + $0x40] sm:$0xff] %v2367_v48  ;;  %1019 = vst [vmem:[%s1009_s18 + $0x48] sm:$0xff] %v2371_v12  ;;  %v981_v61 = vmul.f32 %v2369_v24, %v2369_v24  ;;  %v982_v18 = vmul.f32 %v2375_v34, %v2375_v34  ;;  %v983_v20 = vmul.f32 %v2379_v44, %v2379_v44  ;;  %1613 = vmatprep.mubr.msk.f32.mxu0 (!%p1506_p0), %vm1923_vm12, %v1924_v53 }
 0x1ed   : > { %1020 = vst [vmem:[%s1009_s18 + $0x50] sm:$0xff] %v2365_v52  ;;  %1021 = vst [vmem:[%s1009_s18 + $0x58] sm:$0xff] %v2369_v24  ;;  %v949_v56 = vadd.f32 %v948_v46, %v892_v43  ;;  %v988_v0 = vadd.f32 %v987_v58, %v973_v54  ;;  %v984_v21 = vmul.f32 %v2373_v31, %v2373_v31  ;;  %1648 = vmatprep.mubr.msk.f32.mxu1 (!%p1506_p0), %vm1923_vm12, %v1924_v53  ;;  %v1035_v54 = vld [vmem:[%s2694_s5 + $0x20] sm:$0xff] (!%p1506_p0)  ;;  %v1038_v58 = vld [vmem:[%s2694_s5 + $0x38] sm:$0xff] (!%p1506_p0) }
 0x1ee   : > { %1022 = vst [vmem:[%s1009_s18 + $0x60] sm:$0xff] %v2375_v34  ;;  %1023 = vst [vmem:[%s1009_s18 + $0x68] sm:$0xff] %v2379_v44  ;;  %v985_v26 = vmul.f32 %v2377_v40, %v2377_v40  ;;  %v1655_v46 = vpack.c.bf16 (!%p1506_p0), %v1034_v51, %v1033_v49 }
 0x1ef   : > { %1024 = vst [vmem:[%s1009_s18 + $0x70] sm:$0xff] %v2373_v31  ;;  %1025 = vst [vmem:[%s1009_s18 + $0x78] sm:$0xff] %v2377_v40  ;;  %v950_v59 = vadd.f32 %v949_v56, %v895_v27  ;;  %v989_v3 = vadd.f32 %v988_v0, %v974_v38  ;;  %v1031_v27 = vld [vmem:[%s2694_s5] sm:$0xff] (!%p1506_p0)  ;;  %v1658_v56 = vpack.c.bf16 (!%p1506_p0), %v1036_v55, %v1035_v54  ;;  %v1037_v38 = vld [vmem:[%s2694_s5 + $0x30] sm:$0xff] (!%p1506_p0) }
 0x1f0   : > { %v1652_v50 = vpack.c.bf16 (!%p1506_p0), %v1032_v47, %v1031_v27  ;;  %v1040_v0 = vld [vmem:[%s2694_s5 + $0x48] sm:$0xff] (!%p1506_p0) }
 0x1f1   : > { %v951_v62 = vadd.f32 %v950_v59, %v900_v36  ;;  %v990_v1 = vadd.f32 %v989_v3, %v975_v60  ;;  %v1661_v59 = vpack.c.bf16 (!%p1506_p0), %v1038_v58, %v1037_v38  ;;  %v1039_v60 = vld [vmem:[%s2694_s5 + $0x40] sm:$0xff] (!%p1506_p0)  ;;  %v1042_v3 = vld [vmem:[%s2694_s5 + $0x58] sm:$0xff] (!%p1506_p0) }
 0x1f2   : > { %1653 = vmatpush3.bf16.msra.mxu0 (!%p1506_p0), %v1652_v50  ;;  %1677 = vmatpush3.bf16.msra.mxu1 (!%p1506_p0), %v1652_v50 }
 0x1f3   : > { %v952_v41 = vadd.f32 %v951_v62, %v903_v4  ;;  %v991_v8 = vadd.f32 %v990_v1, %v976_v63  ;;  %v969_v4 = vld [vmem:[#allocation3] sm:$0x1]  ;;  %1654 = vmatprep.subr.bf16.mxu0 (!%p1506_p0), %v1922_v39  ;;  %1678 = vmatprep.subr.bf16.mxu1 (!%p1506_p0), %v1922_v39  ;;  %v1664_v62 = vpack.c.bf16 (!%p1506_p0), %v1040_v0, %v1039_v60  ;;  %v1041_v63 = vld [vmem:[%s2694_s5 + $0x50] sm:$0xff] (!%p1506_p0)  ;;  %v1044_v1 = vld [vmem:[%s2694_s5 + $0x68] sm:$0xff] (!%p1506_p0) }
 0x1f5   : > { %v953_v6 = vadd.f32 %v952_v41, %v2367_v48  ;;  %v992_v11 = vadd.f32 %v991_v8, %v977_v5  ;;  %v1667_v41 = vpack.c.bf16 (!%p1506_p0), %v1042_v3, %v1041_v63  ;;  %v1043_v5 = vld [vmem:[%s2694_s5 + $0x60] sm:$0xff] (!%p1506_p0)  ;;  %v1046_v8 = vld [vmem:[%s2694_s5 + $0x78] sm:$0xff] (!%p1506_p0) }
 0x1f6   : > { %1656 = vmatpush3.bf16.msra.mxu0 (!%p1506_p0), %v1655_v46  ;;  %1680 = vmatpush3.bf16.msra.mxu1 (!%p1506_p0), %v1655_v46  ;;  %v1291_v53 = vld [vmem:[%s2382_s15 + $0x80] sm:$0xff] (!%p1506_p0)  ;;  %v1292_v46 = vld [vmem:[%s2382_s15 + $0x88] sm:$0xff] (!%p1506_p0)  ;;  %v1293_v54 = vld [vmem:[%s2382_s15 + $0x90] sm:$0xff] (!%p1506_p0) }
 0x1f7   : > { %v954_v9 = vadd.f32 %v953_v6, %v2371_v12  ;;  %v993_v57 = vadd.f32 %v992_v11, %v978_v7  ;;  %1657 = vmatprep.subr.bf16.mxu0 (!%p1506_p0), %v1922_v39  ;;  %1681 = vmatprep.subr.bf16.mxu1 (!%p1506_p0), %v1922_v39  ;;  %v1670_v6 = vpack.c.bf16 (!%p1506_p0), %v1044_v1, %v1043_v5  ;;  %v1045_v7 = vld [vmem:[%s2694_s5 + $0x70] sm:$0xff] (!%p1506_p0)  ;;  %v1295_v60 = vld [vmem:[%s2382_s15 + $0xa0] sm:$0xff] (!%p1506_p0) }
 0x1f8   : > { %v1296_v0 = vld [vmem:[%s2382_s15 + $0xa8] sm:$0xff] (!%p1506_p0) }
 0x1f9   : > { %v955_v13 = vadd.f32 %v954_v9, %v2365_v52  ;;  %v994_v16 = vadd.f32 %v993_v57, %v979_v10  ;;  %v1673_v9 = vpack.c.bf16 (!%p1506_p0), %v1046_v8, %v1045_v7 }
 0x1fa   : > { %1659 = vmatpush3.bf16.msra.mxu0 (!%p1506_p0), %v1658_v56  ;;  %1683 = vmatpush3.bf16.msra.mxu1 (!%p1506_p0), %v1658_v56 }
 0x1fb   : > { %v956_v15 = vadd.f32 %v955_v13, %v2369_v24  ;;  %v995_v48 = vadd.f32 %v994_v16, %v980_v14  ;;  %1660 = vmatprep.subr.bf16.mxu0 (!%p1506_p0), %v1922_v39  ;;  %1684 = vmatprep.subr.bf16.mxu1 (!%p1506_p0), %v1922_v39 }
 0x1fd   : > { %v957_v17 = vadd.f32 %v956_v15, %v2375_v34  ;;  %v996_v22 = vadd.f32 %v995_v48, %v981_v61 }
 0x1fe   : > { %1662 = vmatpush3.bf16.msra.mxu0 (!%p1506_p0), %v1661_v59  ;;  %1686 = vmatpush3.bf16.msra.mxu1 (!%p1506_p0), %v1661_v59  ;;  %v1294_v59 = vld [vmem:[%s2382_s15 + $0x98] sm:$0xff] (!%p1506_p0) }
 0x1ff   : > { %v958_v19 = vadd.f32 %v957_v17, %v2379_v44  ;;  %v997_v25 = vadd.f32 %v996_v22, %v982_v18  ;;  %1663 = vmatprep.subr.bf16.mxu0 (!%p1506_p0), %v1922_v39  ;;  %1687 = vmatprep.subr.bf16.mxu1 (!%p1506_p0), %v1922_v39  ;;  %v1194_v22 = vld [vmem:[%s2692_s3] sm:$0x1] (!%p1506_p0) }
 0x201   : > { %v959_v52 = vadd.f32 %v958_v19, %v2373_v31  ;;  %v998_v12 = vadd.f32 %v997_v25, %v983_v20  ;;  %v1216_v19 = vlaneseq (!%p1506_p0)  ;;  %v1196_v25 = vld [vmem:[%s2693_s4] sm:$0x1] (!%p1506_p0) }
 0x202   : > { %1665 = vmatpush3.bf16.msra.mxu0 (!%p1506_p0), %v1664_v62  ;;  %1689 = vmatpush3.bf16.msra.mxu1 (!%p1506_p0), %v1664_v62 }
 0x203   : > { %v960_v24 = vadd.f32 %v959_v52, %v2377_v40  ;;  %v999_v29 = vadd.f32 %v998_v12, %v984_v21  ;;  %1666 = vmatprep.subr.bf16.mxu0 (!%p1506_p0), %v1922_v39  ;;  %1690 = vmatprep.subr.bf16.mxu1 (!%p1506_p0), %v1922_v39  ;;  %v1217_v20 = vshrl.u32 (!%p1506_p0), %v1216_v19, 7  ;;  %v1200_v12 = vld [vmem:[%s2382_s15 + $0x8] sm:$0xff] (!%p1506_p0) }
 0x205   : > { %v961_v28 = vrot.slane %v960_v24, 4  ;;  %v1000_v32 = vadd.f32 %v999_v29, %v985_v26  ;;  %v1218_v52 = vsub.s32 (!%p1506_p0), 0, %v1217_v20  ;;  %v1202_v29 = vld [vmem:[%s2382_s15 + $0x18] sm:$0xff] (!%p1506_p0) }
 0x206   : > { %1668 = vmatpush3.bf16.msra.mxu0 (!%p1506_p0), %v1667_v41  ;;  %1692 = vmatpush3.bf16.msra.mxu1 (!%p1506_p0), %v1667_v41 }
 0x207   : > { %v962_v30 = vadd.f32 %v961_v28, %v960_v24  ;;  %v1001_v33 = vrot.slane %v1000_v32, 4  ;;  %1669 = vmatprep.subr.bf16.mxu0 (!%p1506_p0), %v1922_v39  ;;  %1693 = vmatprep.subr.bf16.mxu1 (!%p1506_p0), %v1922_v39  ;;  %v1199_v24 = vld [vmem:[%s2382_s15] sm:$0xff] (!%p1506_p0)  ;;  %v1201_v28 = vld [vmem:[%s2382_s15 + $0x10] sm:$0xff] (!%p1506_p0) }
 0x209   : > { %v963_v23 = vrot.slane %v962_v30, 2  ;;  %v1002_v35 = vadd.f32 %v1001_v33, %v1000_v32  ;;  %v1204_v32 = vld [vmem:[%s2382_s15 + $0x28] sm:$0xff] (!%p1506_p0) }
 0x20a   : > { %1671 = vmatpush3.bf16.msra.mxu0 (!%p1506_p0), %v1670_v6  ;;  %1695 = vmatpush3.bf16.msra.mxu1 (!%p1506_p0), %v1670_v6 }
 0x20b   : > { %v964_v34 = vadd.f32 %v963_v23, %v962_v30  ;;  %v1003_v37 = vrot.slane %v1002_v35, 2  ;;  %1672 = vmatprep.subr.bf16.mxu0 (!%p1506_p0), %v1922_v39  ;;  %1696 = vmatprep.subr.bf16.mxu1 (!%p1506_p0), %v1922_v39  ;;  %v1203_v30 = vld [vmem:[%s2382_s15 + $0x20] sm:$0xff] (!%p1506_p0)  ;;  %v1205_v23 = vld [vmem:[%s2382_s15 + $0x30] sm:$0xff] (!%p1506_p0) }
 0x20d   : > { %v965_v36 = vrot.slane %v964_v34, 1  ;;  %v1004_v31 = vadd.f32 %v1003_v37, %v1002_v35  ;;  %v1207_v35 = vld [vmem:[%s2382_s15 + $0x40] sm:$0xff] (!%p1506_p0) }
 0x20e   : > { %1674 = vmatpush3.bf16.msra.mxu0 (!%p1506_p0), %v1673_v9  ;;  %1698 = vmatpush3.bf16.msra.mxu1 (!%p1506_p0), %v1673_v9 }
 0x20f   : > { %v966_v43 = vadd.f32 %v965_v36, %v964_v34  ;;  %v1005_v44 = vrot.slane %v1004_v31, 1  ;;  %1029 = sbr.rel (%p1506_p0) target bundleno = 806 (0x326), region = 52  ;;  %v1206_v34 = vld [vmem:[%s2382_s15 + $0x38] sm:$0xff] (!%p1506_p0)  ;;  %v1208_v36 = vld [vmem:[%s2382_s15 + $0x48] sm:$0xff] (!%p1506_p0) }
 0x211   : > { %v967_v2 = vadd.f32 %v966_v43, %v945_v42  ;;  %v1006_v45 = vadd.f32 %v1005_v44, %v1004_v31  ;;  %v1209_v42 = vld [vmem:[%s2382_s15 + $0x50] sm:$0xff] (!%p1506_p0)  ;;  %v1210_v43 = vld [vmem:[%s2382_s15 + $0x58] sm:$0xff] (!%p1506_p0)  ;;  %v1211_v31 = vld [vmem:[%s2382_s15 + $0x60] sm:$0xff] (!%p1506_p0) }
 0x212   : > { %v1212_v44 = vld [vmem:[%s2382_s15 + $0x68] sm:$0xff] (!%p1506_p0) }
 0x213   : > { %968 = vst [vmem:[#allocation2] sm:$0x1] %v967_v2  ;;  %v1007_v40 = vadd.f32 %v1006_v45, %v969_v4  ;;  %v1213_v4 = vld [vmem:[%s2382_s15 + $0x70] sm:$0xff] (!%p1506_p0)  ;;  %v1214_v45 = vld [vmem:[%s2382_s15 + $0x78] sm:$0xff] (!%p1506_p0) }
 0x215   : > { %1008 = vst [vmem:[#allocation3] sm:$0x1] %v1007_v40 }
 0x21a   : > { %v1030_v10 = vld [vmem:[#allocation2] sm:$0x1] }
 0x21b   : > { %1614 = vmatmul.mubr.f32.vlgmr.msra.gmra.mrb[0].mxu0 %v1030_v10 }
 0x21c   : > { %v1117_v11 = vld [vmem:[#allocation3] sm:$0x1] }
 0x21d   : > { %1649 = vmatmul.mubr.f32.vlgmr.msra.gmra.mrb[0].mxu1 %v1117_v11 }
 0x2ee   : > { %v1113_v13 = vpop.f32.mrb[0].mxu0 }
 0x2ef   : > { %v1188_v57 = vmul.f32 0.001953125, %v1113_v13  ;;  %v1615_v15 = vpop.f32.mrb[1].mxu0 }
 0x2f0   : > { %v1184_v14 = vpop.f32.mrb[0].mxu1 }
 0x2f1   : > { %v1189_v61 = vmul.f32 0.001953125, %v1184_v14  ;;  %v1650_v16 = vpop.f32.mrb[1].mxu1  ;;  %v1190_v17 = vmul.f32 %v1188_v57, %v1188_v57 }
 0x2f3   : > { %v1191_v18 = vsub.f32 %v1189_v61, %v1190_v17 }
 0x2f5   : > { %v1192_v48 = vadd.f32 1e-05, %v1191_v18 }
 0x2f7   : > { %1815 = vrsqrt.f32 %v1192_v48 }
 0x301   : > { %v1816_v21 = vpop.eup %1815 }
 0x302   : > { %v1195_v26 = vmul.f32 %v1816_v21, %v1194_v22 }
 0x304   : > { %v1197_v33 = vmul.f32 %v1195_v26, %v1188_v57  ;;  %v2485_v37 = vrot.slane %v1195_v26, %v1218_v52  ;;  %v1297_v26 = vld [vmem:[%s2382_s15 + $0xb0] sm:$0xff] }
 0x306   : > { %v1198_v2 = vsub.f32 %v1196_v25, %v1197_v33  ;;  %v1221_v40 = vmul.f32 %v2485_v37, %v1199_v24  ;;  %v1222_v27 = vmul.f32 %v2485_v37, %v1200_v12  ;;  %v1223_v47 = vmul.f32 %v2485_v37, %v1201_v28  ;;  %v1298_v12 = vld [vmem:[%s2382_s15 + $0xb8] sm:$0xff]  ;;  %v1300_v33 = vld [vmem:[%s2382_s15 + $0xc8] sm:$0xff] }
 0x307   : > { %v1224_v49 = vmul.f32 %v2485_v37, %v1202_v29  ;;  %v1225_v39 = vmul.f32 %v2485_v37, %v1203_v30  ;;  %v1226_v50 = vmul.f32 %v2485_v37, %v1204_v32  ;;  %v1227_v51 = vmul.f32 %v2485_v37, %v1205_v23  ;;  %v1299_v23 = vld [vmem:[%s2382_s15 + $0xc0] sm:$0xff] }
 0x308   : > { %v1228_v55 = vmul.f32 %v2485_v37, %v1206_v34  ;;  %v1229_v56 = vmul.f32 %v2485_v37, %v1207_v35  ;;  %v1230_v38 = vmul.f32 %v2485_v37, %v1208_v36  ;;  %v1231_v58 = vmul.f32 %v2485_v37, %v1209_v42 }
 0x309   : > { %v1232_v62 = vmul.f32 %v2485_v37, %v1210_v43  ;;  %v1233_v63 = vmul.f32 %v2485_v37, %v1211_v31  ;;  %v1234_v3 = vmul.f32 %v2485_v37, %v1212_v44  ;;  %v1235_v41 = vmul.f32 %v2485_v37, %v1213_v4  ;;  %v1301_v43 = vld [vmem:[%s2382_s15 + $0xd0] sm:$0xff]  ;;  %v1302_v31 = vld [vmem:[%s2382_s15 + $0xd8] sm:$0xff] }
 0x30a   : > { %v1236_v5 = vmul.f32 %v2485_v37, %v1214_v45  ;;  %v2515_v1 = vrot.slane %v1198_v2, %v1218_v52  ;;  %v2518_v6 = vmul.f32 %v1291_v53, %v2485_v37  ;;  %v2521_v7 = vmul.f32 %v1292_v46, %v2485_v37  ;;  %v1306_v53 = vld [vmem:[%s2382_s15 + $0xf8] sm:$0xff] }
 0x30b   : > { %v2524_v8 = vmul.f32 %v1293_v54, %v2485_v37  ;;  %v2527_v9 = vmul.f32 %v1294_v59, %v2485_v37  ;;  %v2530_v10 = vmul.f32 %v1295_v60, %v2485_v37  ;;  %v2533_v11 = vmul.f32 %v1296_v0, %v2485_v37 }
 0x30c   : > { %v1243_v13 = vadd.f32 %v2515_v1, %v1221_v40  ;;  %v1244_v14 = vadd.f32 %v2515_v1, %v1222_v27  ;;  %v1245_v57 = vadd.f32 %v2515_v1, %v1223_v47  ;;  %v1246_v15 = vadd.f32 %v2515_v1, %v1224_v49  ;;  %v1303_v40 = vld [vmem:[%s2382_s15 + $0xe0] sm:$0xff]  ;;  %v1304_v27 = vld [vmem:[%s2382_s15 + $0xe8] sm:$0xff] }
 0x30d   : > { %v1247_v61 = vadd.f32 %v2515_v1, %v1225_v39  ;;  %v1248_v16 = vadd.f32 %v2515_v1, %v1226_v50  ;;  %v1249_v17 = vadd.f32 %v2515_v1, %v1227_v51  ;;  %v1250_v18 = vadd.f32 %v2515_v1, %v1228_v55  ;;  %v1305_v51 = vld [vmem:[%s2382_s15 + $0xf0] sm:$0xff] }
 0x30e   : > { %v1251_v48 = vadd.f32 %v2515_v1, %v1229_v56  ;;  %v1252_v19 = vadd.f32 %v2515_v1, %v1230_v38  ;;  %v1253_v20 = vadd.f32 %v2515_v1, %v1231_v58  ;;  %v1254_v22 = vadd.f32 %v2515_v1, %v1232_v62 }
 0x30f   : > { %v1255_v52 = vadd.f32 %v2515_v1, %v1233_v63  ;;  %v1256_v21 = vadd.f32 %v2515_v1, %v1234_v3  ;;  %v1257_v25 = vadd.f32 %v2515_v1, %v1235_v41  ;;  %v1258_v24 = vadd.f32 %v2515_v1, %v1236_v5 }
 0x310   : > { %v1259_v28 = vmax.f32 %v1243_v13, 0.0  ;;  %v1260_v29 = vmax.f32 %v1244_v14, 0.0  ;;  %v1261_v30 = vmax.f32 %v1245_v57, 0.0  ;;  %v1262_v32 = vmax.f32 %v1246_v15, 0.0 }
 0x311   : > { %v1263_v34 = vmax.f32 %v1247_v61, 0.0  ;;  %v1264_v35 = vmax.f32 %v1248_v16, 0.0  ;;  %v1265_v36 = vmax.f32 %v1249_v17, 0.0  ;;  %v1266_v42 = vmax.f32 %v1250_v18, 0.0 }
 0x312   : > { %v1267_v2 = vmax.f32 %v1251_v48, 0.0  ;;  %v1268_v44 = vmax.f32 %v1252_v19, 0.0  ;;  %v1269_v4 = vmax.f32 %v1253_v20, 0.0  ;;  %v1270_v45 = vmax.f32 %v1254_v22, 0.0  ;;  %1275 = vst [vmem:[%s2382_s15] sm:$0xff] %v1259_v28  ;;  %1276 = vst [vmem:[%s2382_s15 + $0x8] sm:$0xff] %v1260_v29 }
 0x313   : > { %1277 = vst [vmem:[%s2382_s15 + $0x10] sm:$0xff] %v1261_v30  ;;  %1278 = vst [vmem:[%s2382_s15 + $0x18] sm:$0xff] %v1262_v32  ;;  %v1271_v47 = vmax.f32 %v1255_v52, 0.0  ;;  %v1272_v49 = vmax.f32 %v1256_v21, 0.0  ;;  %v1273_v39 = vmax.f32 %v1257_v25, 0.0  ;;  %v1274_v50 = vmax.f32 %v1258_v24, 0.0 }
 0x314   : > { %1279 = vst [vmem:[%s2382_s15 + $0x20] sm:$0xff] %v1263_v34  ;;  %1280 = vst [vmem:[%s2382_s15 + $0x28] sm:$0xff] %v1264_v35  ;;  %v1313_v46 = vmul.f32 %v1297_v26, %v2485_v37  ;;  %v1314_v54 = vmul.f32 %v1298_v12, %v2485_v37  ;;  %v1315_v55 = vmul.f32 %v1299_v23, %v2485_v37 }
 0x315   : > { %1281 = vst [vmem:[%s2382_s15 + $0x30] sm:$0xff] %v1265_v36  ;;  %1282 = vst [vmem:[%s2382_s15 + $0x38] sm:$0xff] %v1266_v42  ;;  %v1316_v56 = vmul.f32 %v1300_v33, %v2485_v37  ;;  %v1317_v38 = vmul.f32 %v1301_v43, %v2485_v37  ;;  %v1318_v58 = vmul.f32 %v1302_v31, %v2485_v37 }
 0x316   : > { %1283 = vst [vmem:[%s2382_s15 + $0x40] sm:$0xff] %v1267_v2  ;;  %1284 = vst [vmem:[%s2382_s15 + $0x48] sm:$0xff] %v1268_v44  ;;  %v1319_v59 = vmul.f32 %v1303_v40, %v2485_v37  ;;  %v1320_v60 = vmul.f32 %v1304_v27, %v2485_v37  ;;  %v1321_v0 = vmul.f32 %v1305_v51, %v2485_v37 }
 0x317   : > { %1285 = vst [vmem:[%s2382_s15 + $0x50] sm:$0xff] %v1269_v4  ;;  %1286 = vst [vmem:[%s2382_s15 + $0x58] sm:$0xff] %v1270_v45  ;;  %v1322_v62 = vmul.f32 %v1306_v53, %v2485_v37  ;;  %v1323_v63 = vadd.f32 %v2518_v6, %v2515_v1  ;;  %v1324_v3 = vadd.f32 %v2521_v7, %v2515_v1 }
 0x318   : > { %1287 = vst [vmem:[%s2382_s15 + $0x60] sm:$0xff] %v1271_v47  ;;  %1288 = vst [vmem:[%s2382_s15 + $0x68] sm:$0xff] %v1272_v49  ;;  %v1325_v41 = vadd.f32 %v2524_v8, %v2515_v1  ;;  %v1326_v5 = vadd.f32 %v2527_v9, %v2515_v1  ;;  %v1327_v13 = vadd.f32 %v2530_v10, %v2515_v1 }
 0x319   : > { %1289 = vst [vmem:[%s2382_s15 + $0x70] sm:$0xff] %v1273_v39  ;;  %1290 = vst [vmem:[%s2382_s15 + $0x78] sm:$0xff] %v1274_v50  ;;  %v1328_v14 = vadd.f32 %v2533_v11, %v2515_v1  ;;  %v1329_v37 = vadd.f32 %v1313_v46, %v2515_v1  ;;  %v1330_v57 = vadd.f32 %v1314_v54, %v2515_v1  ;;  %v1339_v16 = vmax.f32 %v1323_v63, 0.0 }
 0x31a   : > { %v1331_v6 = vadd.f32 %v1315_v55, %v2515_v1  ;;  %v1332_v7 = vadd.f32 %v1316_v56, %v2515_v1  ;;  %v1333_v15 = vadd.f32 %v1317_v38, %v2515_v1  ;;  %v1334_v8 = vadd.f32 %v1318_v58, %v2515_v1 }
 0x31b   : > { %v1335_v9 = vadd.f32 %v1319_v59, %v2515_v1  ;;  %v1336_v10 = vadd.f32 %v1320_v60, %v2515_v1  ;;  %v1337_v11 = vadd.f32 %v1321_v0, %v2515_v1  ;;  %v1338_v61 = vadd.f32 %v1322_v62, %v2515_v1  ;;  %1355 = vst [vmem:[%s2382_s15 + $0x80] sm:$0xff] %v1339_v16 }
 0x31c   : > { %v1340_v17 = vmax.f32 %v1324_v3, 0.0  ;;  %v1341_v18 = vmax.f32 %v1325_v41, 0.0  ;;  %v1342_v48 = vmax.f32 %v1326_v5, 0.0  ;;  %v1343_v19 = vmax.f32 %v1327_v13, 0.0 }
 0x31d   : > { %v1344_v20 = vmax.f32 %v1328_v14, 0.0  ;;  %v1345_v22 = vmax.f32 %v1329_v37, 0.0  ;;  %v1346_v52 = vmax.f32 %v1330_v57, 0.0  ;;  %v1347_v21 = vmax.f32 %v1331_v6, 0.0 }
 0x31e   : > { %v1348_v25 = vmax.f32 %v1332_v7, 0.0  ;;  %1356 = vst [vmem:[%s2382_s15 + $0x88] sm:$0xff] %v1340_v17  ;;  %v1349_v1 = vmax.f32 %v1333_v15, 0.0  ;;  %v1350_v24 = vmax.f32 %v1334_v8, 0.0  ;;  %v1351_v26 = vmax.f32 %v1335_v9, 0.0  ;;  %1357 = vst [vmem:[%s2382_s15 + $0x90] sm:$0xff] %v1341_v18 }
 0x31f   : > { %v1352_v12 = vmax.f32 %v1336_v10, 0.0  ;;  %1358 = vst [vmem:[%s2382_s15 + $0x98] sm:$0xff] %v1342_v48  ;;  %1359 = vst [vmem:[%s2382_s15 + $0xa0] sm:$0xff] %v1343_v19  ;;  %v1353_v28 = vmax.f32 %v1337_v11, 0.0  ;;  %v1354_v29 = vmax.f32 %v1338_v61, 0.0 }
 0x320   : > { %1360 = vst [vmem:[%s2382_s15 + $0xa8] sm:$0xff] %v1344_v20  ;;  %1361 = vst [vmem:[%s2382_s15 + $0xb0] sm:$0xff] %v1345_v22 }
 0x321   : > { %1362 = vst [vmem:[%s2382_s15 + $0xb8] sm:$0xff] %v1346_v52  ;;  %1363 = vst [vmem:[%s2382_s15 + $0xc0] sm:$0xff] %v1347_v21 }
 0x322   : > { %1364 = vst [vmem:[%s2382_s15 + $0xc8] sm:$0xff] %v1348_v25  ;;  %1365 = vst [vmem:[%s2382_s15 + $0xd0] sm:$0xff] %v1349_v1 }
 0x323   : > { %1366 = vst [vmem:[%s2382_s15 + $0xd8] sm:$0xff] %v1350_v24  ;;  %1367 = vst [vmem:[%s2382_s15 + $0xe0] sm:$0xff] %v1351_v26 }
 0x324   : > { %1368 = vst [vmem:[%s2382_s15 + $0xe8] sm:$0xff] %v1352_v12  ;;  %1369 = vst [vmem:[%s2382_s15 + $0xf0] sm:$0xff] %v1353_v28 }
 0x325   : > { %1370 = vst [vmem:[%s2382_s15 + $0xf8] sm:$0xff] %v1354_v29 }
 0x326 PF: > { %s1513_s12 = sshll.u32 %s1899_s25, 12  ;;  %s1385_s19 = sshll.u32 %s2382_s15, 4  ;;  %s2632_s19 = int_to_ptr.vmem [resolvable:$true] %s1385_s19 }
 0x327   : > { %s2629_s18 = scalar_lea.hbm %s2695_s6, %s1513_s12  ;;  %s2702_s16 = sand.u32 1, %s1887_s22  }
 0x328   : > { %s2636_s17 = scalar_lea.sflag [#allocation5], %s2702_s16  ;;  %s1817_s20 = scalar_lea.vmem %s2632_s19, 4096 }
 0x329   : > { %p1818_p1 = scmp.ne.s32.totalorder %s2632_s19, %s1817_s20  ;;  %s1925_s25 = smov [#allocation4]  }
 0x32a   : > { %s1821_s11 = sshll.u32 %s1925_s25, 4  ;;  %s1822_s11 = int_to_ptr.vmem [resolvable:$false] %s1821_s11 }
 0x32b   : > { %p1819_p2 = pnand %p1818_p1, %p2011_p3  ;;  %s1823_s29 = scalar_lea.vmem %s1822_s11, 8192 }
 0x32c   : > { %p1824_p5 = scmp.lt.s32.totalorder %s2632_s19, %s1822_s11  ;;  %p1825_p6 = scmp.lt.s32.totalorder %s1823_s29, %s1817_s20 }
 0x32d   : > { %p1820_p4 = pneg %p1819_p2 }
 0x32e   : > { %p1826_p7 = por %p1825_p6, %p1824_p5 }
 0x330   : > { %p1827_p8 = pnand %p1826_p7, %p1820_p4 }
 0x332   : > { %1830 = shalt.err (!%p1827_p8)
}
 0x333   : > { %s1831_s15 = scalar_lea.hbm %s2629_s18, 4096  ;;  %s1835_s24 = scalar_lea.hbm %s2695_s6, 8192 }
 0x334   : > { %p1832_p10 = scmp.ne.s32.totalorder %s2629_s18, %s1831_s15  ;;  %p1836_p13 = scmp.lt.u32.totalorder %s2629_s18, %s2695_s6 }
 0x335   : > { %p1837_p0 = scmp.lt.u32.totalorder %s1835_s24, %s1831_s15  ;;  %p1839_p2 = scmp.lt.u32.totalorder %s1831_s15, %s2629_s18 }
 0x336   : > { %p1833_p11 = pnand %p1832_p10, %p2011_p3 }
 0x337   : > { %p1838_p1 = por %p1837_p0, %p1836_p13 }
 0x338   : > { %p1834_p12 = pneg %p1833_p11 }
 0x339   : > { %p1840_p4 = por %p1839_p2, %p1838_p1 }
 0x33b   : > { %p1841_p5 = pnand %p1840_p4, %p1834_p12 }
 0x33d   : > { %1844 = shalt.err (!%p1841_p5)
}
 0x33e   : > { %s1926_s20 = smov 128  }
 0x33f   : > { %1708 = dma.vmem_to_hbm [thread:$0]  (%p2011_p3), %s2632_s19, 4096, %s2629_s18, %s2636_s17, %s1926_s20, %s1926_s20, %s1914_s30  }
 0x340 PF: > { %p1714_p6 = scmp.ge.s32.totalorder %s1911_s28, 2  ;;  %s1400_s11 = sand.u32 1, %s1883_s21  }
 0x341   : > { %s1401_s29 = scalar_lea.sflag [#allocation5], %s1400_s11 }
 0x342   : > { %p1711_p7 = pnand %p1714_p6, %p2021_p9 }
 0x344   : > { %1878 = dma.done.wait (!%p1711_p7), %s1401_s29, 4096  }
 0x345   : > { %1880 = vsyncadd (!%p1711_p7), %s1401_s29, 4294963200  ;;  %s19_s28 = sadd.s32 1, %s1911_s28   ;;  %s2703_s21 = smov %s1887_s22 }
 0x346   : > { %p16_p8 = scmp.ge.s32.totalorder %s19_s28, 6   ;;  %s2704_s22 = smov %s1891_s23 }
 0x347   : > { %s2705_s23 = smov %s2029_s13  ;;  %s2706_s24 = smov %s1903_s26 }
 0x348   : > { %s2707_s25 = smov %s1907_s27  ;;  %s2708_s26 = smov %s2711_s7 }
 0x349   : > { %s2709_s27 = smov %s2715_s8  ;;  %18 = sbr.rel (!%p16_p8) target bundleno = 5 (0x5), region = 89 }
 0x350   :  { %1406 = vsyncpa [#allocation5], 1 }
 0x351   :  { %1408 = vsyncpa [#allocation5 + $0x1], 1 }

</bundles_post_ra>
